<compile_context>
chip_gen: v6e
topology: v6e:2x2x1
jax: 0.10.0
libtpu: 0.0.40
codegen_flags: <defaults>
</compile_context>

<pallas_src>
import functools

import jax
import jax.numpy as jnp
import numpy as np
from jax.experimental import pallas as pl
from jax.experimental.pallas import tpu as pltpu


def _convdeepset_kernel(x_ref, t_ref, y_ref, coef_ref, w_ref, b_ref,
                        o_ref, acc_ref, *, n_val_channels, out_channels,
                        shared_sigma, exp_dtype):
    """One (block_b, tile_nout) output tile, one tile_nin reduction chunk.

    x_ref:    (Bt, tin, 1)          VMEM  observation locations (chunk k)
    t_ref:    (Bt, 1,  Tn)          VMEM  target locations (targets on lanes)
    y_ref:    (Cy, Bt, tin, 1)      VMEM  value channels, pre-split per channel
    coef_ref: (Cy+1,)               SMEM  per-channel RBF coeff  -0.5/scale^2
    w_ref:    ((Cy+1)*out_ch,)      SMEM  Linear weight, row-major (C, out_ch)
    b_ref:    (out_ch,)             SMEM  Linear bias
    o_ref:    (Bt, out_ch, Tn)      VMEM  output tile (lane-dense Tn)
    acc_ref:  (Cy+1, Bt, 1, Tn)     VMEM  running channel sums over n_in chunks
    """
    k = pl.program_id(2)

    @pl.when(k == 0)
    def _init():
        acc_ref[...] = jnp.zeros_like(acc_ref)

    x = x_ref[...]                       # (Bt, tin, 1)
    t = t_ref[...]                       # (Bt, 1,  Tn)
    d = jnp.square(x - t)                # (Bt, tin, Tn)

    def rbf(coef):                       # coef: f32 scalar read from SMEM
        arg = d * coef
        if exp_dtype == jnp.float32:
            return jnp.exp(arg)
        # bf16 EUP path (v6e/v7x): exp in bf16, everything else stays f32.
        return jnp.exp(arg.astype(exp_dtype)).astype(jnp.float32)

    if shared_sigma:
        # One exp shared by the density channel and every value channel.
        wt = rbf(coef_ref[0])                                    # (Bt,tin,Tn)
        acc_ref[0] += jnp.sum(wt, axis=1, keepdims=True)         # density
        for c in range(n_val_channels):                          # tiny, unrolled
            yc = y_ref[c]                                        # (Bt,tin,1)
            acc_ref[c + 1] += jnp.sum(wt * yc, axis=1, keepdims=True)
    else:
        acc_ref[0] += jnp.sum(rbf(coef_ref[0]), axis=1, keepdims=True)
        for c in range(n_val_channels):
            yc = y_ref[c]
            acc_ref[c + 1] += jnp.sum(rbf(coef_ref[c + 1]) * yc,
                                      axis=1, keepdims=True)

    @pl.when(k == pl.num_programs(2) - 1)
    def _finalize():
        density = acc_ref[0]                                     # (Bt,1,Tn)
        # exact reciprocal: the extra Newton steps ride on VPU slack.
        inv_density = pl.reciprocal(density + 1e-8, approx=False)
        rows = [density] + [acc_ref[c + 1] * inv_density
                            for c in range(n_val_channels)]
        # Fused pointwise Linear as scalar(SMEM)-splat FMAs; far too small
        # for the MXU (K=C~3, N=out_ch~8).
        for o in range(out_channels):
            val = rows[0] * w_ref[o]
            for c in range(n_val_channels):
                val = val + rows[c + 1] * w_ref[(c + 1) * out_channels + o]
            val = val + b_ref[o]
            o_ref[:, o:o + 1, :] = val.astype(o_ref.dtype)


def _round_up(x, m):
    return (x + m - 1) // m * m


def _largest_divisor_leq(n, cap):
    cap = max(1, min(n, cap))
    while n % cap:
        cap -= 1
    return cap


def _vmem_limit_bytes():
    """Generation-aware VMEM limit (v7x only has 64 MiB per TensorCore)."""
    try:
        cap = int(pltpu.get_tpu_info().vmem_capacity_bytes)
    except Exception:                    # be conservative: assume the smallest
        cap = 64 << 20
    # 3/4 of physical leaves head-room for double-buffering / compiler temps.
    # (On v5e this could be raised toward ~100 MiB to grow block_b further.)
    return min(int(cap * 3 // 4), 64 << 20)


def conv_deep_set_forward(context_x, context_y, t, sigma, w, b, *,
                          shared_sigma=None, use_bf16_exp=False,
                          tile_nin=None):
    """Pallas forward of ConvDeepSet (use_density=True).

    context_x: (B, n_in, 1)  observation locations
    context_y: (B, n_in, Cy) observation values (density channel is implicit)
    t:         (B, n_out, 1) target locations
    sigma:     (Cy+1,)       log length scales (density channel first)
    w:         (Cy+1, out_channels)  Linear weight (``y_out @ w + b`` layout)
    b:         (out_channels,)
    returns:   (B, n_out, out_channels)
    """
    if context_x.ndim == 2:
        context_x = context_x[..., None]
    if context_y.ndim == 2:
        context_y = context_y[..., None]
    if t.ndim == 2:
        t = t[..., None]

    B, n_in, _ = context_x.shape
    n_out = t.shape[1]
    Cy = context_y.shape[2]            # raw value channels
    C = Cy + 1                         # + implicit density channel
    out_channels = w.shape[1]

    # Shared-lengthscale fast path: detect statically when sigma is concrete.
    if shared_sigma is None:
        try:
            s = np.asarray(sigma)
            shared_sigma = bool(np.all(s == s.reshape(-1)[0]))
        except Exception:              # traced under jit: stay on general path
            shared_sigma = False

    vmem_limit = _vmem_limit_bytes()
    big_budget = vmem_limit // 2       # share reserved for live intermediates

    # --- n_out tiling: pad to a lane-dense multiple of 128, tile <= 512. ----
    tile_nout = min(512, _round_up(n_out, 128))
    n_out_pad = _round_up(n_out, tile_nout)
    grid_j = n_out_pad // tile_nout

    # --- n_in tiling (reduction axis): chunk so d + wt fit the budget. ------
    if tile_nin is None:
        nin_cap = max(8, (big_budget // (2 * 4 * tile_nout)) // 8 * 8)
        tile_nin = min(_round_up(n_in, 8), nin_cap, 4096)
    else:
        tile_nin = max(8, (int(tile_nin) // 8) * 8)
        tile_nin = min(tile_nin, _round_up(n_in, 8))
    n_in_pad = _round_up(n_in, tile_nin)
    grid_k = n_in_pad // tile_nin

    # --- batch blocking: amortize per-step overhead within the VMEM budget. -
    per_row = (2 * tile_nin * tile_nout * 4          # d + wt (f32, live together)
               + C * tile_nout * 4                   # accumulator rows
               + 2 * out_channels * tile_nout * 4    # double-buffered out block
               + 2 * tile_nout * 4                   # double-buffered t block
               + 2 * (Cy + 1) * tile_nin * 4)        # double-buffered x/y blocks
    block_b = _largest_divisor_leq(B, max(1, big_budget // per_row))
    # v7x has 2 TensorCores: keep at least 2 parallel grid steps when possible.
    # TODO(synk): evaluate pltpu.CORE_PARALLEL on a verified-v7x path.
    if (B // block_b) * grid_j < 2 and B >= 2:
        block_b = _largest_divisor_leq(B, B // 2)
    grid = (B // block_b, grid_j, grid_k)

    # --- one-time parameter / layout prep (outside the grid loop). ----------
    f32 = jnp.float32
    coef = (-0.5 / jnp.square(jnp.exp(sigma))).astype(f32)        # (C,)
    w_flat = w.astype(f32).reshape(C * out_channels)              # (C*out_ch,)
    b_vec = b.astype(f32).reshape(out_channels)                   # (out_ch,)

    # targets on the 128 lanes: (B, 1, n_out_pad); edge-pad keeps exp finite.
    t_row = jnp.transpose(t.astype(f32), (0, 2, 1))
    if n_out_pad != n_out:
        t_row = jnp.pad(t_row, ((0, 0), (0, 0), (0, n_out_pad - n_out)),
                        mode="edge")

    # observation locations; padded rows get a far-away sentinel so their RBF
    # weight underflows to exactly 0.
    x_col = context_x.astype(f32)
    if n_in_pad != n_in:
        x_col = jnp.pad(x_col, ((0, 0), (0, n_in_pad - n_in), (0, 0)),
                        constant_values=1e9)

    # value channels pre-split per channel: (Cy, B, n_in_pad, 1)
    y_split = jnp.moveaxis(context_y.astype(f32), 2, 0)[..., None]
    if n_in_pad != n_in:
        y_split = jnp.pad(y_split,
                          ((0, 0), (0, 0), (0, n_in_pad - n_in), (0, 0)))

    kernel = functools.partial(
        _convdeepset_kernel,
        n_val_channels=Cy, out_channels=out_channels,
        shared_sigma=bool(shared_sigma),
        exp_dtype=jnp.bfloat16 if use_bf16_exp else jnp.float32)

    out_cn = pl.pallas_call(
        kernel,
        out_shape=jax.ShapeDtypeStruct((B, out_channels, n_out_pad), f32),
        grid_spec=pltpu.PrefetchScalarGridSpec(
            num_scalar_prefetch=0,
            grid=grid,
            in_specs=[
                pl.BlockSpec((block_b, tile_nin, 1),
                             lambda bi, ji, ki: (bi, ki, 0)),
                pl.BlockSpec((block_b, 1, tile_nout),
                             lambda bi, ji, ki: (bi, 0, ji)),
                pl.BlockSpec((Cy, block_b, tile_nin, 1),
                             lambda bi, ji, ki: (0, bi, ki, 0)),
                pl.BlockSpec(memory_space=pltpu.MemorySpace.SMEM),
                pl.BlockSpec(memory_space=pltpu.MemorySpace.SMEM),
                pl.BlockSpec(memory_space=pltpu.MemorySpace.SMEM),
            ],
            out_specs=pl.BlockSpec((block_b, out_channels, tile_nout),
                                   lambda bi, ji, ki: (bi, 0, ji)),
            scratch_shapes=[pltpu.VMEM((C, block_b, 1, tile_nout), f32)],
        ),
        compiler_params=pltpu.CompilerParams(
            dimension_semantics=("parallel", "parallel", "arbitrary"),
            vmem_limit_bytes=vmem_limit),
    )(x_col, t_row, y_split, coef, w_flat, b_vec)

    # (B, out_ch, n_out_pad) -> (B, n_out, out_ch): one cheap XLA transpose
    # keeps every in-kernel store lane-dense; padding sliced off here.
    return jnp.transpose(out_cn, (0, 2, 1))[:, :n_out, :]


def conv_deep_set_reference(context_x, context_y, t, sigma, w, b):
    """Pure-JAX mirror of the PyTorch forward (correctness check)."""
    cx = context_x if context_x.ndim == 3 else context_x[..., None]
    cy = context_y if context_y.ndim == 3 else context_y[..., None]
    tt = t if t.ndim == 3 else t[..., None]
    B, n_in, _ = cx.shape
    dists = jnp.square(cx[:, :, None, 0] - tt[:, None, :, 0])    # (B,n_in,n_out)
    scales = jnp.exp(sigma)[None, None, None, :]
    wt = jnp.exp(-0.5 * dists[..., None] / scales ** 2)          # (B,n_in,n_out,C)
    density = jnp.ones((B, n_in, 1), cy.dtype)
    y_out = jnp.concatenate([density, cy], axis=2)               # (B,n_in,C)
    y_out = (y_out[:, :, None, :] * wt).sum(1)                   # (B,n_out,C)
    den, conv = y_out[..., :1], y_out[..., 1:]
    y_out = jnp.concatenate([den, conv / (den + 1e-8)], axis=-1)
    return y_out @ w + b


if __name__ == "__main__":
    key = jax.random.PRNGKey(0)

    def check(case, out, ref, atol=1e-4, rtol=1e-4):
        assert out.shape == ref.shape, (case, out.shape, ref.shape)
        err = float(jnp.max(jnp.abs(out - ref)))
        assert jnp.allclose(out, ref, atol=atol, rtol=rtol), (
            f"{case}: mismatch vs reference, max abs err {err}")

    fwd = jax.jit(conv_deep_set_forward,
                  static_argnames=("shared_sigma", "use_bf16_exp", "tile_nin"))

    # --- case 1: shared length scale (fast path), lane-aligned n_out --------
    B, n_in, n_out, Cy, out_ch = 4, 16, 384, 2, 8
    C = Cy + 1
    k1, k2, k3 = jax.random.split(key, 3)
    context_x = jax.random.uniform(k1, (B, n_in, 1), jnp.float32, -2.0, 2.0)
    context_y = jax.random.normal(k2, (B, n_in, Cy), dtype=jnp.float32)
    t_grid = jnp.linspace(-2.0, 2.0, n_out, dtype=jnp.float32)
    t = jnp.broadcast_to(t_grid[None, :, None], (B, n_out, 1))
    sigma = jnp.full((C,), jnp.log(0.1), dtype=jnp.float32)
    w = jax.random.normal(k3, (C, out_ch), dtype=jnp.float32) / jnp.sqrt(
        jnp.float32(C))
    b_lin = jnp.zeros((out_ch,), dtype=jnp.float32)

    out1 = jax.block_until_ready(
        fwd(context_x, context_y, t, sigma, w, b_lin, shared_sigma=True))
    check("shared-sigma", out1,
          conv_deep_set_reference(context_x, context_y, t, sigma, w, b_lin))

    # --- case 2: per-channel length scales (general path) -------------------
    sigma2 = jnp.log(jnp.array([0.1, 0.2, 0.3], dtype=jnp.float32))
    out2 = jax.block_until_ready(
        fwd(context_x, context_y, t, sigma2, w, b_lin, shared_sigma=False))
    check("per-channel-sigma", out2,
          conv_deep_set_reference(context_x, context_y, t, sigma2, w, b_lin))

    # --- case 3: ragged n_out / n_in -> padding + n_in reduction axis -------
    B3, n_in3, n_out3 = 2, 20, 200
    k4, k5, k6 = jax.random.split(k3, 3)
    cx3 = jax.random.uniform(k4, (B3, n_in3, 1), jnp.float32, -2.0, 2.0)
    cy3 = jax.random.normal(k5, (B3, n_in3, Cy), dtype=jnp.float32)
    t3 = jnp.broadcast_to(
        jnp.linspace(-2.0, 2.0, n_out3, dtype=jnp.float32)[None, :, None],
        (B3, n_out3, 1))
    b3 = jax.random.normal(k6, (out_ch,), dtype=jnp.float32) * 0.1
    out3 = jax.block_until_ready(
        fwd(cx3, cy3, t3, sigma2, w, b3, shared_sigma=False, tile_nin=8))
    check("ragged+nin-reduction", out3,
          conv_deep_set_reference(cx3, cy3, t3, sigma2, w, b3))

    print("KERNEL_OK")
</pallas_src>

<mosaic_0001>
module attributes {stable_mosaic.version = 11 : i64} {
  func.func @_convdeepset_kernel(%arg0: i32, %arg1: i32, %arg2: i32, %arg3: memref<2x16x1xf32, #tpu.memory_space<vmem>>, %arg4: memref<2x1x384xf32, #tpu.memory_space<vmem>>, %arg5: memref<2x2x16x1xf32, #tpu.memory_space<vmem>>, %arg6: memref<3xf32, #tpu.memory_space<smem>>, %arg7: memref<24xf32, #tpu.memory_space<smem>>, %arg8: memref<8xf32, #tpu.memory_space<smem>>, %arg9: memref<2x8x384xf32, #tpu.memory_space<vmem>>, %arg10: memref<3x2x1x384xf32, #tpu.memory_space<vmem>>) attributes {dimension_semantics = [#tpu.dimension_semantics<parallel>, #tpu.dimension_semantics<parallel>, #tpu.dimension_semantics<arbitrary>], iteration_bounds = array<i64: 2, 1, 1>, scalar_prefetch = 0 : i64, scratch_operands = 1 : i64, tpu.core_type = #tpu.core_type<tc>, window_params = [{transform_indices = @transform_0, window_bounds = array<i64: 2, 16, 1>}, {transform_indices = @transform_1, window_bounds = array<i64: 2, 1, 384>}, {transform_indices = @transform_2, window_bounds = array<i64: 2, 2, 16, 1>}, {transform_indices = @transform_3, window_bounds = array<i64: 3>}, {transform_indices = @transform_4, window_bounds = array<i64: 24>}, {transform_indices = @transform_5, window_bounds = array<i64: 8>}, {transform_indices = @transform_6, window_bounds = array<i64: 2, 8, 384>}]} {
    %c0_i32 = arith.constant 0 : i32
    %0 = arith.cmpi eq, %arg2, %c0_i32 : i32
    %1 = arith.extui %0 : i1 to i32
    %c0_i32_0 = arith.constant 0 : i32
    %2 = arith.cmpi ne, %1, %c0_i32_0 : i32
    scf.if %2 {
      %cst_41 = arith.constant 0.000000e+00 : f32
      %48 = vector.broadcast %cst_41 : f32 to vector<3x2x1x384xf32>
      %c0_42 = arith.constant 0 : index
      %c0_43 = arith.constant 0 : index
      %c0_44 = arith.constant 0 : index
      %c0_45 = arith.constant 0 : index
      %49 = vector.load %arg10[%c0_42, %c0_43, %c0_44, %c0_45] : memref<3x2x1x384xf32, #tpu.memory_space<vmem>>, vector<3x2x1x384xf32>
      tpu.vector_store %arg10[%c0_42, %c0_43, %c0_44, %c0_45], %48 {strides = array<i32>} : memref<3x2x1x384xf32, #tpu.memory_space<vmem>>, vector<3x2x1x384xf32>,
    } else {
    }
    %c0 = arith.constant 0 : index
    %c0_1 = arith.constant 0 : index
    %c0_2 = arith.constant 0 : index
    %3 = vector.load %arg3[%c0, %c0_1, %c0_2] : memref<2x16x1xf32, #tpu.memory_space<vmem>>, vector<2x16x1xf32>
    %c0_3 = arith.constant 0 : index
    %c0_4 = arith.constant 0 : index
    %c0_5 = arith.constant 0 : index
    %4 = vector.load %arg4[%c0_3, %c0_4, %c0_5] : memref<2x1x384xf32, #tpu.memory_space<vmem>>, vector<2x1x384xf32>
    %5 = vector.broadcast %3 : vector<2x16x1xf32> to vector<2x16x384xf32>
    %6 = vector.broadcast %4 : vector<2x1x384xf32> to vector<2x16x384xf32>
    %7 = arith.subf %5, %6 : vector<2x16x384xf32>
    %8 = arith.mulf %7, %7 : vector<2x16x384xf32>
    %c0_6 = arith.constant 0 : index
    %9 = memref.load %arg6[%c0_6] : memref<3xf32, #tpu.memory_space<smem>>
    %10 = vector.broadcast %9 : f32 to vector<2x16x384xf32>
    %11 = arith.mulf %8, %10 : vector<2x16x384xf32>
    %12 = math.exp %11 : vector<2x16x384xf32>
    %c0_7 = arith.constant 0 : index
    %c0_8 = arith.constant 0 : index
    %c0_9 = arith.constant 0 : index
    %c0_10 = arith.constant 0 : index
    %13 = vector.load %arg10[%c0_7, %c0_8, %c0_9, %c0_10] : memref<3x2x1x384xf32, #tpu.memory_space<vmem>>, vector<1x2x1x384xf32>
    %14 = vector.shape_cast %13 : vector<1x2x1x384xf32> to vector<2x1x384xf32>
    %cst = arith.constant dense<0.000000e+00> : vector<2x384xf32>
    %15 = vector.multi_reduction <add>, %12, %cst [1] : vector<2x16x384xf32> to vector<2x384xf32>
    %16 = vector.shape_cast %15 : vector<2x384xf32> to vector<2x1x384xf32>
    %17 = arith.addf %14, %16 : vector<2x1x384xf32>
    %c0_11 = arith.constant 0 : index
    %c0_12 = arith.constant 0 : index
    %c0_13 = arith.constant 0 : index
    %c0_14 = arith.constant 0 : index
    %18 = vector.load %arg10[%c0_11, %c0_12, %c0_13, %c0_14] : memref<3x2x1x384xf32, #tpu.memory_space<vmem>>, vector<1x2x1x384xf32>
    %19 = vector.shape_cast %18 : vector<1x2x1x384xf32> to vector<2x1x384xf32>
    %20 = vector.shape_cast %17 : vector<2x1x384xf32> to vector<1x2x1x384xf32>
    tpu.vector_store %arg10[%c0_11, %c0_12, %c0_13, %c0_14], %20 {strides = array<i32>} : memref<3x2x1x384xf32, #tpu.memory_space<vmem>>, vector<1x2x1x384xf32>,
    %c0_15 = arith.constant 0 : index
    %c0_16 = arith.constant 0 : index
    %c0_17 = arith.constant 0 : index
    %c0_18 = arith.constant 0 : index
    %21 = vector.load %arg5[%c0_15, %c0_16, %c0_17, %c0_18] : memref<2x2x16x1xf32, #tpu.memory_space<vmem>>, vector<1x2x16x1xf32>
    %22 = vector.shape_cast %21 : vector<1x2x16x1xf32> to vector<2x16x1xf32>
    %c1 = arith.constant 1 : index
    %c0_19 = arith.constant 0 : index
    %c0_20 = arith.constant 0 : index
    %c0_21 = arith.constant 0 : index
    %23 = vector.load %arg10[%c1, %c0_19, %c0_20, %c0_21] : memref<3x2x1x384xf32, #tpu.memory_space<vmem>>, vector<1x2x1x384xf32>
    %24 = vector.shape_cast %23 : vector<1x2x1x384xf32> to vector<2x1x384xf32>
    %25 = vector.broadcast %22 : vector<2x16x1xf32> to vector<2x16x384xf32>
    %26 = arith.mulf %12, %25 : vector<2x16x384xf32>
    %cst_22 = arith.constant dense<0.000000e+00> : vector<2x384xf32>
    %27 = vector.multi_reduction <add>, %26, %cst_22 [1] : vector<2x16x384xf32> to vector<2x384xf32>
    %28 = vector.shape_cast %27 : vector<2x384xf32> to vector<2x1x384xf32>
    %29 = arith.addf %24, %28 : vector<2x1x384xf32>
    %c1_23 = arith.constant 1 : index
    %c0_24 = arith.constant 0 : index
    %c0_25 = arith.constant 0 : index
    %c0_26 = arith.constant 0 : index
    %30 = vector.load %arg10[%c1_23, %c0_24, %c0_25, %c0_26] : memref<3x2x1x384xf32, #tpu.memory_space<vmem>>, vector<1x2x1x384xf32>
    %31 = vector.shape_cast %30 : vector<1x2x1x384xf32> to vector<2x1x384xf32>
    %32 = vector.shape_cast %29 : vector<2x1x384xf32> to vector<1x2x1x384xf32>
    tpu.vector_store %arg10[%c1_23, %c0_24, %c0_25, %c0_26], %32 {strides = array<i32>} : memref<3x2x1x384xf32, #tpu.memory_space<vmem>>, vector<1x2x1x384xf32>,
    %c1_27 = arith.constant 1 : index
    %c0_28 = arith.constant 0 : index
    %c0_29 = arith.constant 0 : index
    %c0_30 = arith.constant 0 : index
    %33 = vector.load %arg5[%c1_27, %c0_28, %c0_29, %c0_30] : memref<2x2x16x1xf32, #tpu.memory_space<vmem>>, vector<1x2x16x1xf32>
    %34 = vector.shape_cast %33 : vector<1x2x16x1xf32> to vector<2x16x1xf32>
    %c2 = arith.constant 2 : index
    %c0_31 = arith.constant 0 : index
    %c0_32 = arith.constant 0 : index
    %c0_33 = arith.constant 0 : index
    %35 = vector.load %arg10[%c2, %c0_31, %c0_32, %c0_33] : memref<3x2x1x384xf32, #tpu.memory_space<vmem>>, vector<1x2x1x384xf32>
    %36 = vector.shape_cast %35 : vector<1x2x1x384xf32> to vector<2x1x384xf32>
    %37 = vector.broadcast %34 : vector<2x16x1xf32> to vector<2x16x384xf32>
    %38 = arith.mulf %12, %37 : vector<2x16x384xf32>
    %cst_34 = arith.constant dense<0.000000e+00> : vector<2x384xf32>
    %39 = vector.multi_reduction <add>, %38, %cst_34 [1] : vector<2x16x384xf32> to vector<2x384xf32>
    %40 = vector.shape_cast %39 : vector<2x384xf32> to vector<2x1x384xf32>
    %41 = arith.addf %36, %40 : vector<2x1x384xf32>
    %c2_35 = arith.constant 2 : index
    %c0_36 = arith.constant 0 : index
    %c0_37 = arith.constant 0 : index
    %c0_38 = arith.constant 0 : index
    %42 = vector.load %arg10[%c2_35, %c0_36, %c0_37, %c0_38] : memref<3x2x1x384xf32, #tpu.memory_space<vmem>>, vector<1x2x1x384xf32>
    %43 = vector.shape_cast %42 : vector<1x2x1x384xf32> to vector<2x1x384xf32>
    %44 = vector.shape_cast %41 : vector<2x1x384xf32> to vector<1x2x1x384xf32>
    tpu.vector_store %arg10[%c2_35, %c0_36, %c0_37, %c0_38], %44 {strides = array<i32>} : memref<3x2x1x384xf32, #tpu.memory_space<vmem>>, vector<1x2x1x384xf32>,
    %c0_i32_39 = arith.constant 0 : i32
    %45 = arith.cmpi eq, %arg2, %c0_i32_39 : i32
    %46 = arith.extui %45 : i1 to i32
    %c0_i32_40 = arith.constant 0 : i32
    %47 = arith.cmpi ne, %46, %c0_i32_40 : i32
    scf.if %47 {
      %c0_41 = arith.constant 0 : index
      %c0_42 = arith.constant 0 : index
      %c0_43 = arith.constant 0 : index
      %c0_44 = arith.constant 0 : index
      %48 = vector.load %arg10[%c0_41, %c0_42, %c0_43, %c0_44] : memref<3x2x1x384xf32, #tpu.memory_space<vmem>>, vector<1x2x1x384xf32>
      %49 = vector.shape_cast %48 : vector<1x2x1x384xf32> to vector<2x1x384xf32>
      %cst_45 = arith.constant 9.99999993E-9 : f32
      %50 = vector.broadcast %cst_45 : f32 to vector<2x1x384xf32>
      %51 = arith.addf %49, %50 : vector<2x1x384xf32>
      %52 = tpu.reciprocal %51 : vector<2x1x384xf32> -> vector<2x1x384xf32>
      %c1_46 = arith.constant 1 : index
      %c0_47 = arith.constant 0 : index
      %c0_48 = arith.constant 0 : index
      %c0_49 = arith.constant 0 : index
      %53 = vector.load %arg10[%c1_46, %c0_47, %c0_48, %c0_49] : memref<3x2x1x384xf32, #tpu.memory_space<vmem>>, vector<1x2x1x384xf32>
      %54 = vector.shape_cast %53 : vector<1x2x1x384xf32> to vector<2x1x384xf32>
      %55 = arith.mulf %54, %52 : vector<2x1x384xf32>
      %c2_50 = arith.constant 2 : index
      %c0_51 = arith.constant 0 : index
      %c0_52 = arith.constant 0 : index
      %c0_53 = arith.constant 0 : index
      %56 = vector.load %arg10[%c2_50, %c0_51, %c0_52, %c0_53] : memref<3x2x1x384xf32, #tpu.memory_space<vmem>>, vector<1x2x1x384xf32>
      %57 = vector.shape_cast %56 : vector<1x2x1x384xf32> to vector<2x1x384xf32>
      %58 = arith.mulf %57, %52 : vector<2x1x384xf32>
      %c0_54 = arith.constant 0 : index
      %59 = memref.load %arg7[%c0_54] : memref<24xf32, #tpu.memory_space<smem>>
      %60 = vector.broadcast %59 : f32 to vector<2x1x384xf32>
      %61 = arith.mulf %49, %60 : vector<2x1x384xf32>
      %c8 = arith.constant 8 : index
      %62 = memref.load %arg7[%c8] : memref<24xf32, #tpu.memory_space<smem>>
      %63 = vector.broadcast %62 : f32 to vector<2x1x384xf32>
      %64 = arith.mulf %55, %63 : vector<2x1x384xf32>
      %65 = arith.addf %61, %64 : vector<2x1x384xf32>
      %c16 = arith.constant 16 : index
      %66 = memref.load %arg7[%c16] : memref<24xf32, #tpu.memory_space<smem>>
      %67 = vector.broadcast %66 : f32 to vector<2x1x384xf32>
      %68 = arith.mulf %58, %67 : vector<2x1x384xf32>
      %69 = arith.addf %65, %68 : vector<2x1x384xf32>
      %c0_55 = arith.constant 0 : index
      %70 = memref.load %arg8[%c0_55] : memref<8xf32, #tpu.memory_space<smem>>
      %71 = vector.broadcast %70 : f32 to vector<2x1x384xf32>
      %72 = arith.addf %69, %71 : vector<2x1x384xf32>
      %c0_56 = arith.constant 0 : index
      %c0_57 = arith.constant 0 : index
      %c0_58 = arith.constant 0 : index
      %73 = vector.load %arg9[%c0_56, %c0_57, %c0_58] : memref<2x8x384xf32, #tpu.memory_space<vmem>>, vector<2x1x384xf32>
      tpu.vector_store %arg9[%c0_56, %c0_57, %c0_58], %72 {strides = array<i32>} : memref<2x8x384xf32, #tpu.memory_space<vmem>>, vector<2x1x384xf32>,
      %c1_59 = arith.constant 1 : index
      %74 = memref.load %arg7[%c1_59] : memref<24xf32, #tpu.memory_space<smem>>
      %75 = vector.broadcast %74 : f32 to vector<2x1x384xf32>
      %76 = arith.mulf %49, %75 : vector<2x1x384xf32>
      %c9 = arith.constant 9 : index
      %77 = memref.load %arg7[%c9] : memref<24xf32, #tpu.memory_space<smem>>
      %78 = vector.broadcast %77 : f32 to vector<2x1x384xf32>
      %79 = arith.mulf %55, %78 : vector<2x1x384xf32>
      %80 = arith.addf %76, %79 : vector<2x1x384xf32>
      %c17 = arith.constant 17 : index
      %81 = memref.load %arg7[%c17] : memref<24xf32, #tpu.memory_space<smem>>
      %82 = vector.broadcast %81 : f32 to vector<2x1x384xf32>
      %83 = arith.mulf %58, %82 : vector<2x1x384xf32>
      %84 = arith.addf %80, %83 : vector<2x1x384xf32>
      %c1_60 = arith.constant 1 : index
      %85 = memref.load %arg8[%c1_60] : memref<8xf32, #tpu.memory_space<smem>>
      %86 = vector.broadcast %85 : f32 to vector<2x1x384xf32>
      %87 = arith.addf %84, %86 : vector<2x1x384xf32>
      %c0_61 = arith.constant 0 : index
      %c1_62 = arith.constant 1 : index
      %c0_63 = arith.constant 0 : index
      %88 = vector.load %arg9[%c0_61, %c1_62, %c0_63] : memref<2x8x384xf32, #tpu.memory_space<vmem>>, vector<2x1x384xf32>
      tpu.vector_store %arg9[%c0_61, %c1_62, %c0_63], %87 {strides = array<i32>} : memref<2x8x384xf32, #tpu.memory_space<vmem>>, vector<2x1x384xf32>,
      %c2_64 = arith.constant 2 : index
      %89 = memref.load %arg7[%c2_64] : memref<24xf32, #tpu.memory_space<smem>>
      %90 = vector.broadcast %89 : f32 to vector<2x1x384xf32>
      %91 = arith.mulf %49, %90 : vector<2x1x384xf32>
      %c10 = arith.constant 10 : index
      %92 = memref.load %arg7[%c10] : memref<24xf32, #tpu.memory_space<smem>>
      %93 = vector.broadcast %92 : f32 to vector<2x1x384xf32>
      %94 = arith.mulf %55, %93 : vector<2x1x384xf32>
      %95 = arith.addf %91, %94 : vector<2x1x384xf32>
      %c18 = arith.constant 18 : index
      %96 = memref.load %arg7[%c18] : memref<24xf32, #tpu.memory_space<smem>>
      %97 = vector.broadcast %96 : f32 to vector<2x1x384xf32>
      %98 = arith.mulf %58, %97 : vector<2x1x384xf32>
      %99 = arith.addf %95, %98 : vector<2x1x384xf32>
      %c2_65 = arith.constant 2 : index
      %100 = memref.load %arg8[%c2_65] : memref<8xf32, #tpu.memory_space<smem>>
      %101 = vector.broadcast %100 : f32 to vector<2x1x384xf32>
      %102 = arith.addf %99, %101 : vector<2x1x384xf32>
      %c0_66 = arith.constant 0 : index
      %c2_67 = arith.constant 2 : index
      %c0_68 = arith.constant 0 : index
      %103 = vector.load %arg9[%c0_66, %c2_67, %c0_68] : memref<2x8x384xf32, #tpu.memory_space<vmem>>, vector<2x1x384xf32>
      tpu.vector_store %arg9[%c0_66, %c2_67, %c0_68], %102 {strides = array<i32>} : memref<2x8x384xf32, #tpu.memory_space<vmem>>, vector<2x1x384xf32>,
      %c3 = arith.constant 3 : index
      %104 = memref.load %arg7[%c3] : memref<24xf32, #tpu.memory_space<smem>>
      %105 = vector.broadcast %104 : f32 to vector<2x1x384xf32>
      %106 = arith.mulf %49, %105 : vector<2x1x384xf32>
      %c11 = arith.constant 11 : index
      %107 = memref.load %arg7[%c11] : memref<24xf32, #tpu.memory_space<smem>>
      %108 = vector.broadcast %107 : f32 to vector<2x1x384xf32>
      %109 = arith.mulf %55, %108 : vector<2x1x384xf32>
      %110 = arith.addf %106, %109 : vector<2x1x384xf32>
      %c19 = arith.constant 19 : index
      %111 = memref.load %arg7[%c19] : memref<24xf32, #tpu.memory_space<smem>>
      %112 = vector.broadcast %111 : f32 to vector<2x1x384xf32>
      %113 = arith.mulf %58, %112 : vector<2x1x384xf32>
      %114 = arith.addf %110, %113 : vector<2x1x384xf32>
      %c3_69 = arith.constant 3 : index
      %115 = memref.load %arg8[%c3_69] : memref<8xf32, #tpu.memory_space<smem>>
      %116 = vector.broadcast %115 : f32 to vector<2x1x384xf32>
      %117 = arith.addf %114, %116 : vector<2x1x384xf32>
      %c0_70 = arith.constant 0 : index
      %c3_71 = arith.constant 3 : index
      %c0_72 = arith.constant 0 : index
      %118 = vector.load %arg9[%c0_70, %c3_71, %c0_72] : memref<2x8x384xf32, #tpu.memory_space<vmem>>, vector<2x1x384xf32>
      tpu.vector_store %arg9[%c0_70, %c3_71, %c0_72], %117 {strides = array<i32>} : memref<2x8x384xf32, #tpu.memory_space<vmem>>, vector<2x1x384xf32>,
      %c4 = arith.constant 4 : index
      %119 = memref.load %arg7[%c4] : memref<24xf32, #tpu.memory_space<smem>>
      %120 = vector.broadcast %119 : f32 to vector<2x1x384xf32>
      %121 = arith.mulf %49, %120 : vector<2x1x384xf32>
      %c12 = arith.constant 12 : index
      %122 = memref.load %arg7[%c12] : memref<24xf32, #tpu.memory_space<smem>>
      %123 = vector.broadcast %122 : f32 to vector<2x1x384xf32>
      %124 = arith.mulf %55, %123 : vector<2x1x384xf32>
      %125 = arith.addf %121, %124 : vector<2x1x384xf32>
      %c20 = arith.constant 20 : index
      %126 = memref.load %arg7[%c20] : memref<24xf32, #tpu.memory_space<smem>>
      %127 = vector.broadcast %126 : f32 to vector<2x1x384xf32>
      %128 = arith.mulf %58, %127 : vector<2x1x384xf32>
      %129 = arith.addf %125, %128 : vector<2x1x384xf32>
      %c4_73 = arith.constant 4 : index
      %130 = memref.load %arg8[%c4_73] : memref<8xf32, #tpu.memory_space<smem>>
      %131 = vector.broadcast %130 : f32 to vector<2x1x384xf32>
      %132 = arith.addf %129, %131 : vector<2x1x384xf32>
      %c0_74 = arith.constant 0 : index
      %c4_75 = arith.constant 4 : index
      %c0_76 = arith.constant 0 : index
      %133 = vector.load %arg9[%c0_74, %c4_75, %c0_76] : memref<2x8x384xf32, #tpu.memory_space<vmem>>, vector<2x1x384xf32>
      tpu.vector_store %arg9[%c0_74, %c4_75, %c0_76], %132 {strides = array<i32>} : memref<2x8x384xf32, #tpu.memory_space<vmem>>, vector<2x1x384xf32>,
      %c5 = arith.constant 5 : index
      %134 = memref.load %arg7[%c5] : memref<24xf32, #tpu.memory_space<smem>>
      %135 = vector.broadcast %134 : f32 to vector<2x1x384xf32>
      %136 = arith.mulf %49, %135 : vector<2x1x384xf32>
      %c13 = arith.constant 13 : index
      %137 = memref.load %arg7[%c13] : memref<24xf32, #tpu.memory_space<smem>>
      %138 = vector.broadcast %137 : f32 to vector<2x1x384xf32>
      %139 = arith.mulf %55, %138 : vector<2x1x384xf32>
      %140 = arith.addf %136, %139 : vector<2x1x384xf32>
      %c21 = arith.constant 21 : index
      %141 = memref.load %arg7[%c21] : memref<24xf32, #tpu.memory_space<smem>>
      %142 = vector.broadcast %141 : f32 to vector<2x1x384xf32>
      %143 = arith.mulf %58, %142 : vector<2x1x384xf32>
      %144 = arith.addf %140, %143 : vector<2x1x384xf32>
      %c5_77 = arith.constant 5 : index
      %145 = memref.load %arg8[%c5_77] : memref<8xf32, #tpu.memory_space<smem>>
      %146 = vector.broadcast %145 : f32 to vector<2x1x384xf32>
      %147 = arith.addf %144, %146 : vector<2x1x384xf32>
      %c0_78 = arith.constant 0 : index
      %c5_79 = arith.constant 5 : index
      %c0_80 = arith.constant 0 : index
      %148 = vector.load %arg9[%c0_78, %c5_79, %c0_80] : memref<2x8x384xf32, #tpu.memory_space<vmem>>, vector<2x1x384xf32>
      tpu.vector_store %arg9[%c0_78, %c5_79, %c0_80], %147 {strides = array<i32>} : memref<2x8x384xf32, #tpu.memory_space<vmem>>, vector<2x1x384xf32>,
      %c6 = arith.constant 6 : index
      %149 = memref.load %arg7[%c6] : memref<24xf32, #tpu.memory_space<smem>>
      %150 = vector.broadcast %149 : f32 to vector<2x1x384xf32>
      %151 = arith.mulf %49, %150 : vector<2x1x384xf32>
      %c14 = arith.constant 14 : index
      %152 = memref.load %arg7[%c14] : memref<24xf32, #tpu.memory_space<smem>>
      %153 = vector.broadcast %152 : f32 to vector<2x1x384xf32>
      %154 = arith.mulf %55, %153 : vector<2x1x384xf32>
      %155 = arith.addf %151, %154 : vector<2x1x384xf32>
      %c22 = arith.constant 22 : index
      %156 = memref.load %arg7[%c22] : memref<24xf32, #tpu.memory_space<smem>>
      %157 = vector.broadcast %156 : f32 to vector<2x1x384xf32>
      %158 = arith.mulf %58, %157 : vector<2x1x384xf32>
      %159 = arith.addf %155, %158 : vector<2x1x384xf32>
      %c6_81 = arith.constant 6 : index
      %160 = memref.load %arg8[%c6_81] : memref<8xf32, #tpu.memory_space<smem>>
      %161 = vector.broadcast %160 : f32 to vector<2x1x384xf32>
      %162 = arith.addf %159, %161 : vector<2x1x384xf32>
      %c0_82 = arith.constant 0 : index
      %c6_83 = arith.constant 6 : index
      %c0_84 = arith.constant 0 : index
      %163 = vector.load %arg9[%c0_82, %c6_83, %c0_84] : memref<2x8x384xf32, #tpu.memory_space<vmem>>, vector<2x1x384xf32>
      tpu.vector_store %arg9[%c0_82, %c6_83, %c0_84], %162 {strides = array<i32>} : memref<2x8x384xf32, #tpu.memory_space<vmem>>, vector<2x1x384xf32>,
      %c7 = arith.constant 7 : index
      %164 = memref.load %arg7[%c7] : memref<24xf32, #tpu.memory_space<smem>>
      %165 = vector.broadcast %164 : f32 to vector<2x1x384xf32>
      %166 = arith.mulf %49, %165 : vector<2x1x384xf32>
      %c15 = arith.constant 15 : index
      %167 = memref.load %arg7[%c15] : memref<24xf32, #tpu.memory_space<smem>>
      %168 = vector.broadcast %167 : f32 to vector<2x1x384xf32>
      %169 = arith.mulf %55, %168 : vector<2x1x384xf32>
      %170 = arith.addf %166, %169 : vector<2x1x384xf32>
      %c23 = arith.constant 23 : index
      %171 = memref.load %arg7[%c23] : memref<24xf32, #tpu.memory_space<smem>>
      %172 = vector.broadcast %171 : f32 to vector<2x1x384xf32>
      %173 = arith.mulf %58, %172 : vector<2x1x384xf32>
      %174 = arith.addf %170, %173 : vector<2x1x384xf32>
      %c7_85 = arith.constant 7 : index
      %175 = memref.load %arg8[%c7_85] : memref<8xf32, #tpu.memory_space<smem>>
      %176 = vector.broadcast %175 : f32 to vector<2x1x384xf32>
      %177 = arith.addf %174, %176 : vector<2x1x384xf32>
      %c0_86 = arith.constant 0 : index
      %c7_87 = arith.constant 7 : index
      %c0_88 = arith.constant 0 : index
      %178 = vector.load %arg9[%c0_86, %c7_87, %c0_88] : memref<2x8x384xf32, #tpu.memory_space<vmem>>, vector<2x1x384xf32>
      tpu.vector_store %arg9[%c0_86, %c7_87, %c0_88], %177 {strides = array<i32>} : memref<2x8x384xf32, #tpu.memory_space<vmem>>, vector<2x1x384xf32>,
    } else {
    }
    return
  }
  func.func @transform_0(%arg0: i32, %arg1: i32, %arg2: i32) -> (i32, i32, i32) {
    %c0_i32 = arith.constant 0 : i32
    %c0_i32_0 = arith.constant 0 : i32
    return %arg0, %arg2, %c0_i32 : i32, i32, i32
  }
  func.func @transform_1(%arg0: i32, %arg1: i32, %arg2: i32) -> (i32, i32, i32) {
    %c0_i32 = arith.constant 0 : i32
    %c0_i32_0 = arith.constant 0 : i32
    return %arg0, %c0_i32, %arg1 : i32, i32, i32
  }
  func.func @transform_2(%arg0: i32, %arg1: i32, %arg2: i32) -> (i32, i32, i32, i32) {
    %c0_i32 = arith.constant 0 : i32
    %c0_i32_0 = arith.constant 0 : i32
    %c0_i32_1 = arith.constant 0 : i32
    return %c0_i32, %arg0, %arg2, %c0_i32_0 : i32, i32, i32, i32
  }
  func.func @transform_3(%arg0: i32, %arg1: i32, %arg2: i32) -> i32 {
    %c0_i32 = arith.constant 0 : i32
    %c0_i32_0 = arith.constant 0 : i32
    return %c0_i32 : i32
  }
  func.func @transform_4(%arg0: i32, %arg1: i32, %arg2: i32) -> i32 {
    %c0_i32 = arith.constant 0 : i32
    %c0_i32_0 = arith.constant 0 : i32
    return %c0_i32 : i32
  }
  func.func @transform_5(%arg0: i32, %arg1: i32, %arg2: i32) -> i32 {
    %c0_i32 = arith.constant 0 : i32
    %c0_i32_0 = arith.constant 0 : i32
    return %c0_i32 : i32
  }
  func.func @transform_6(%arg0: i32, %arg1: i32, %arg2: i32) -> (i32, i32, i32) {
    %c0_i32 = arith.constant 0 : i32
    %c0_i32_0 = arith.constant 0 : i32
    return %arg0, %c0_i32, %arg1 : i32, i32, i32
  }
}

</mosaic_0001>

<bundles_post_ra>
// kernel: conv_deep_set_forward.1
= control target key start
LH: loop header
LB: loop body
LE: loop exit
PB: predicated region body
PF: predicated region fallthrough
CT: control target
= control target key end

     0   :  { %s2390_s0 = inlined_call_operand.vmem [shape: f32[4,16,1], index: 0, kind: input, shape index: {}]   ;;  %s2391_s1 = inlined_call_operand.vmem [shape: f32[4,1,384], index: 1, kind: input, shape index: {}]   ;;  %s2392_s2 = inlined_call_operand.vmem [shape: f32[2,4,16,1], index: 2, kind: input, shape index: {}]   ;;  %s2393_s3 = inlined_call_operand.vmem [shape: f32[3], index: 3, kind: input, shape index: {}]   ;;  %s2394_s4 = inlined_call_operand.vmem [shape: f32[24], index: 4, kind: input, shape index: {}]   ;;  %s2395_s5 = inlined_call_operand.vmem [shape: f32[8], index: 5, kind: input, shape index: {}]   ;;  %s2396_s6 = inlined_call_operand.hbm [shape: f32[4,8,384], index: 6, kind: output, shape index: {}]  }
   0x1   :  { %2425 = sst [smem:[#allocation31_spill]] %s2390_s0 }
   0x2   :  { %2426 = sst [smem:[#allocation32_spill]] %s2391_s1 }
   0x3   :  { %2427 = sst [smem:[#allocation33_spill]] %s2392_s2 }
   0x4   :  { %2428 = sst [smem:[#allocation34_spill]] %s2393_s3 }
   0x5   :  { %2429 = sst [smem:[#allocation35_spill]] %s2394_s4 }
   0x6   :  { %2430 = sst [smem:[#allocation36_spill]] %s2395_s5 }
   0x7   :  { %2431 = sst [smem:[#allocation37_spill]] %s2396_s6 }
   0x8   :  { %11 = vsyncpa [#allocation6], 0 }
   0x9   :  { %12 = vsyncpa [#allocation8], 0 }
   0xa   :  { %13 = vsyncpa [#allocation5], 0 }
   0xb   :  { %15 = vsyncpa [#allocation5 + $0x1], 0  ;;  %s1747_s21 = smov 0   ;;  %s1749_s22 = smov 0  }
   0xc   :  { %s1751_s23 = smov 0   ;;  %s1753_s24 = smov 0  }
   0xd   :  { %s1755_s25 = smov 0   ;;  %s1757_s26 = smov 0  }
   0xe LB: > { %2432 = sst [smem:[#allocation14_spill]] %s1681_s21  ;;  %s1371_s27 = sadd.s32 4294967295, %s1701_s26   ;;  %s1701_s26 = sphi %s1757_s26, %s21_s26   ;;  %s1697_s25 = sphi %s1755_s25, %s2490_s25   ;;  %s1693_s24 = sphi %s1753_s24, %s2489_s24   ;;  %s1689_s23 = sphi %s1751_s23, %s2488_s23   ;;  %s1685_s22 = sphi %s1749_s22, %s2487_s22   ;;  %s1681_s21 = sphi %s1747_s21, %s2486_s21  }
   0xf   : > { %2433 = sst [smem:[#allocation15_spill]] %s1685_s22  ;;  %s1372_s28 = sadd.s32 4294967294, %s1701_s26  }
  0x10   : > { %2434 = sst [smem:[#allocation16_spill]] %s1689_s23  ;;  %s40_s29 = sadd.s32 1, %s1697_s25 }
  0x11   : > { %2435 = sst [smem:[#allocation17_spill]] %s1693_s24  ;;  %s105_s30 = sadd.s32 1, %s1689_s23 }
  0x12   : > { %2436 = sst [smem:[#allocation18_spill]] %s1697_s25  ;;  %p42_p0 = scmp.ge.s32.totalorder %s40_s29, 2 }
  0x13   : > { %2437 = sst [smem:[#allocation19_spill]] %s1701_s26  ;;  %p112_p1 = scmp.ne.s32.totalorder %s1689_s23, %s1685_s22 }
  0x14   : > { %p113_p2 = scmp.eq.s32.totalorder %s1701_s26, 0  ;;  %p207_p3 = scmp.eq.s32.totalorder %s1371_s27, 1 }
  0x15   : > { %s2492_s29 = smov (%p42_p0, %s40_s29), 0  ;;  %p212_p6 = scmp.ne.s32.totalorder %s1685_s22, %s1681_s21 }
  0x16   : > { %2438 = sst [smem:[#allocation20_spill]] %s2492_s29  ;;  %p1786_p4 = por %p113_p2, %p112_p1 }
  0x17   : > { %p1790_p5 = por %p207_p3, %p112_p1  ;;  %s100_s9 = ssub.s32 %s1697_s25, %s2492_s29 }
  0x18   : > { %s2439_s7 = scalar_select %p1786_p4, 1, 0 }
  0x19   : > { %s2440_s8 = scalar_select %p1790_p5, 1, 0 }
  0x1a   : > { %p103_p7 = scmp.eq.s32.totalorder %s100_s9, 0  ;;  %p213_p8 = scmp.eq.s32.totalorder %s1372_s28, 1 }
  0x1b   : > { %2441 = sst [smem:[#allocation21_spill]] %s2440_s8  ;;  %p1373_p9 = scmp.ge.s32.totalorder %s1701_s26, 1 }
  0x1c   : > { %p220_p10 = scmp.lt.s32.totalorder %s1701_s26, 3  ;;  %p1803_p11 = por %p213_p8, %p212_p6 }
  0x1d   : > { %s1801_s10 = scalar_select %p103_p7, %s1689_s23, %s105_s30  }
  0x1e   : > { %s2443_s11 = scalar_select %p1803_p11, 1, 0 }
  0x1f   : > { %2442 = sst [smem:[#allocation22_spill]] %s1801_s10  ;;  %p1807_p12 = pnand %p1373_p9, %p220_p10 }
  0x20   : > { %2444 = sst [smem:[#allocation23_spill]] %s2443_s11  ;;  %p1811_p13 = scmp.eq.s32.totalorder %s1371_s27, 0 }
  0x21   : > { %s2445_s12 = scalar_select %p1807_p12, 1, 0 }
  0x22   : > { %s2446_s13 = scalar_select %p1811_p13, 1, 0 }
  0x23   : > { %p1465_p0 = pneg %p1807_p12  ;;  %s2447_s4 = sld [smem:[#allocation35_spill]] }
  0x24   : > { %s2449_s3 = sld [smem:[#allocation34_spill]] }
  0x25   : > { %p1822_p1 = pnand %p1811_p13, %p1465_p0 }
  0x27   : > { %p1574_p3 = pneg %p1822_p1 }
  0x29   : > { %s244_s16 = sshll.u32 %s2447_s4, 4  ;;  %s245_s16 = int_to_ptr.vmem [resolvable:$true] %s244_s16 }
  0x2a   : > { %s233_s20 = sshll.u32 %s2449_s3, 4  ;;  %s1572_s27 = scalar_lea.vmem %s245_s16, 16  ;;  %s234_s20 = int_to_ptr.vmem [resolvable:$true] %s233_s20 }
  0x2b   : > { %p1573_p2 = scmp.ne.s32.totalorder %s245_s16, %s1572_s27  ;;  %p1580_p8 = scmp.lt.s32.totalorder %s245_s16, %s245_s16 }
  0x2c   : > { %p1581_p9 = scmp.lt.s32.totalorder %s1572_s27, %s1572_s27 }
  0x2d   : > { %p1575_p6 = pnand %p1574_p3, %p1573_p2 }
  0x2e   : > { %p1582_p10 = por %p1581_p9, %p1580_p8 }
  0x2f   : > { %p1576_p7 = pneg %p1575_p6 }
  0x31   : > { %p1583_p0 = pnand %p1582_p10, %p1576_p7 }
  0x33   : > { %1586 = shalt.err (!%p1583_p0)
}
  0x34   : > { %s1703_s28 = smov [#allocation7]   ;;  %s2450_s5 = sld [smem:[#allocation36_spill]] }
  0x35   : > { %1471 = dma.vmem_to_smem (!%p1822_p1), %s245_s16, 16, %s1703_s28, [#allocation8]  }
  0x36   : > { %s1587_s15 = scalar_lea.vmem %s234_s20, 16  ;;  %p1595_p5 = scmp.lt.s32.totalorder %s234_s20, %s234_s20 }
  0x37   : > { %p1588_p11 = scmp.ne.s32.totalorder %s234_s20, %s1587_s15  ;;  %p1596_p13 = scmp.lt.s32.totalorder %s1587_s15, %s1587_s15 }
  0x39   : > { %p1590_p2 = pnand %p1588_p11, %p1574_p3  ;;  %p1597_p8 = por %p1596_p13, %p1595_p5 }
  0x3a   : > { %s255_s14 = sshll.u32 %s2450_s5, 4  ;;  %s256_s14 = int_to_ptr.vmem [resolvable:$true] %s255_s14 }
  0x3b   : > { %p1591_p6 = pneg %p1590_p2 }
  0x3d   : > { %p1598_p7 = pnand %p1597_p8, %p1591_p6 }
  0x3f   : > { %1601 = shalt.err (!%p1598_p7)
}
  0x40   : > { %s1704_s18 = smov [#allocation4]   ;;  %s1602_s16 = scalar_lea.vmem %s256_s14, 16 }
  0x41   : > { %1468 = dma.vmem_to_smem (!%p1822_p1), %s234_s20, 16, %s1704_s18, [#allocation6]  }
  0x42   : > { %p1603_p9 = scmp.ne.s32.totalorder %s256_s14, %s1602_s16  ;;  %p1610_p12 = scmp.lt.s32.totalorder %s256_s14, %s256_s14 }
  0x43   : > { %p1611_p11 = scmp.lt.s32.totalorder %s1602_s16, %s1602_s16 }
  0x44   : > { %p1605_p10 = pnand %p1603_p9, %p1574_p3 }
  0x45   : > { %p1612_p2 = por %p1611_p11, %p1610_p12 }
  0x46   : > { %p1606_p0 = pneg %p1605_p10 }
  0x48   : > { %p1613_p4 = pnand %p1612_p2, %p1606_p0 }
  0x4a   : > { %1616 = shalt.err (!%p1613_p4)
}
  0x4b   : > { %s1705_s19 = smov [#allocation9]   ;;  %p1377_p5 = scmp.ge.s32.totalorder %s1701_s26, 2 }
  0x4c   : > { %1474 = dma.vmem_to_smem (!%p1822_p1), %s256_s14, 16, %s1705_s19, [#allocation8]  }
  0x4d   : > { %262 = sbr.rel (%p1377_p5) target bundleno = 96 (0x60), region = 28  ;;  %p2451_p13 = scmp.ne.s32.totalorder (!%p1377_p5), %s2439_s7, 0 }
  0x52   : > { %294 = sbr.rel (!%p2451_p13) target bundleno = 96 (0x60), region = 40  ;;  %s296_s20 = sand.u32 (%p2451_p13), 1, %s1689_s23  }
  0x53   : > { %s1446_s27 = sshll.u32 (%p2451_p13), %s1697_s25, 5  ;;  %s1378_s28 = sshll.u32 (%p2451_p13), %s296_s20, 6 }
  0x54   : > { %s2452_s2 = sld [smem:[#allocation33_spill]] (%p2451_p13)  ;;  %s298_s17 = scalar_lea.vmem (%p2451_p13), [#allocation3], %s1378_s28 }
  0x5a   : > { %s304_s15 = scalar_lea.vmem %s2452_s2, %s1446_s27 }
  0x5b   : > { %v347_v0 = vld [vmem:[%s304_s15] sm:$0xff]  ;;  %v349_v1 = vld [vmem:[%s304_s15 + $0x8] sm:$0xff]  ;;  %v351_v2 = vld [vmem:[%s304_s15 + $0x10] sm:$0xff] }
  0x5c   : > { %348 = vst [vmem:[%s298_s17] sm:$0xff] %v347_v0  ;;  %350 = vst [vmem:[%s298_s17 + $0x8] sm:$0xff] %v349_v1  ;;  %v353_v3 = vld [vmem:[%s304_s15 + $0x18] sm:$0xff]  ;;  %v355_v4 = vld [vmem:[%s304_s15 + $0x40] sm:$0xff] }
  0x5d   : > { %352 = vst [vmem:[%s298_s17 + $0x10] sm:$0xff] %v351_v2  ;;  %v357_v5 = vld [vmem:[%s304_s15 + $0x48] sm:$0xff]  ;;  %354 = vst [vmem:[%s298_s17 + $0x18] sm:$0xff] %v353_v3  ;;  %v359_v6 = vld [vmem:[%s304_s15 + $0x50] sm:$0xff] }
  0x5e   : > { %356 = vst [vmem:[%s298_s17 + $0x20] sm:$0xff] %v355_v4  ;;  %358 = vst [vmem:[%s298_s17 + $0x28] sm:$0xff] %v357_v5  ;;  %v361_v7 = vld [vmem:[%s304_s15 + $0x58] sm:$0xff] }
  0x5f   : > { %360 = vst [vmem:[%s298_s17 + $0x30] sm:$0xff] %v359_v6  ;;  %362 = vst [vmem:[%s298_s17 + $0x38] sm:$0xff] %v361_v7 }
  0x60 PF: > { %p2453_p4 = scmp.ne.s32.totalorder %s2445_s12, 0 }
  0x62   : > { %371 = sbr.rel (%p2453_p4) target bundleno = 374 (0x176), region = 78 }
  0x67   : > { %s1862_s7 = sand.u32 1, %s1685_s22   ;;  %p2455_p12 = scmp.ne.s32.totalorder %s2446_s13, 0 }
  0x68   : > { %2454 = sst [smem:[#allocation24_spill]] %s1862_s7  ;;  %s1383_s14 = sshll.u32 %s1862_s7, 6 }
  0x69   : > { %s1865_s18 = scalar_lea.vmem [#allocation3], %s1383_s14 }
  0x6a   : > { %1668 = dma.done.wait (%p2455_p12), [#allocation6], 16  }
  0x6b   : > { %1670 = vsyncadd (%p2455_p12), [#allocation6], 4294967280 }
  0x6c   : > { %1672 = dma.done.wait (%p2455_p12), [#allocation8], 32  }
  0x6d   : > { %1674 = vsyncadd (%p2455_p12), [#allocation8], 4294967264 }
  0x6e   : > { %392 = sfence }
  0x6f   : > { %s1387_s12 = sshll.u32 %s1693_s24, 1  ;;  %v466_v8 = vlaneseq  ;;  %v1706_v9 = vmov 0   ;;  %s2456_s0 = sld [smem:[#allocation31_spill]]  ;;  %v703_v26 = vld [vmem:[%s1865_s18 + $0x8] sm:$0xff]  ;;  %v702_v27 = vld [vmem:[%s1865_s18] sm:$0xff]  ;;  %v705_v28 = vld [vmem:[%s1865_s18 + $0x18] sm:$0xff] }
  0x70   : > { %1543 = vset.pattern.permute.xlu1 %v1706_v9  ;;  %1542 = vset.pattern.permute.xlu0 %v1706_v9  ;;  %p437_p1 = scmp.lt.s32.totalorder %s1387_s12, 3  ;;  %s2457_s1 = sld [smem:[#allocation32_spill]]  ;;  %v704_v29 = vld [vmem:[%s1865_s18 + $0x10] sm:$0xff]  ;;  %v1392_v30 = vld [vmem:[%s1865_s18 + $0x28] sm:$0xff]  ;;  %v1391_v31 = vld [vmem:[%s1865_s18 + $0x20] sm:$0xff]  ;;  %v1707_v35 = vmov 0.0  }
  0x71   : > { %v1876_v10 = vshrl.u32 %v466_v8, 7  ;;  %v1394_v32 = vld [vmem:[%s1865_s18 + $0x38] sm:$0xff]  ;;  %v1393_v33 = vld [vmem:[%s1865_s18 + $0x30] sm:$0xff]  ;;  %vm1901_vm0 = vcmp.lt.s32.totalorder %v466_v8, 384  ;;  %s558_s15 = sld [smem:[#allocation4]] }
  0x72   : > { %s2494_s12 = smov (!%p437_p1, %s1387_s12), 3  ;;  %470 = vst.msk [vmem:[#allocation2] sm:$0x7] %vm1901_vm0, %v1707_v35  ;;  %471 = vst.msk [vmem:[#allocation2 + $0x3] sm:$0x7] %vm1901_vm0, %v1707_v35  ;;  %s1989_s17 = sld [smem:[#allocation7]] }
  0x73   : > { %s1447_s16 = sshll.u32 %s2494_s12, 4  ;;  %s1449_s19 = smul.u32 3, %s2494_s12  ;;  %v506_v11 = vsub.s32 0, %v1876_v10  ;;  %v510_v12 = vsub.s32 1, %v1876_v10  ;;  %v514_v13 = vsub.s32 2, %v1876_v10 }
  0x74   : > { %472 = vst.msk [vmem:[#allocation2 + $0x6] sm:$0x7] %vm1901_vm0, %v1707_v35  ;;  %473 = vst.msk [vmem:[#allocation2 + $0x9] sm:$0x7] %vm1901_vm0, %v1707_v35  ;;  %s1993_s14 = sld [smem:[#allocation7 + $0x1]] }
  0x75   : > { %s444_s27 = scalar_lea.vmem %s2456_s0, %s1447_s16  ;;  %474 = vst.msk [vmem:[#allocation2 + $0xc] sm:$0x7] %vm1901_vm0, %v1707_v35  ;;  %475 = vst.msk [vmem:[#allocation2 + $0xf] sm:$0x7] %vm1901_vm0, %v1707_v35  ;;  %s1997_s18 = sld [smem:[#allocation7 + $0x2]] }
  0x76   : > { %v478_v14 = vld [vmem:[%s444_s27 + $0x10] sm:$0xff]  ;;  %v476_v15 = vld [vmem:[%s444_s27] sm:$0xff]  ;;  %s455_s9 = scalar_lea.vmem %s2457_s1, %s1449_s19  ;;  %v479_v18 = vld [vmem:[%s444_s27 + $0x18] sm:$0xff]  ;;  %s2003_s12 = sld [smem:[#allocation7 + $0x3]] }
  0x77   : > { %494 = vperm.xlu1 %1543, %v478_v14   ;;  %484 = vperm.xlu0 %1542, %v476_v15   ;;  %v481_v16 = vld [vmem:[%s455_s9 + $0x3] sm:$0x7]  ;;  %v480_v17 = vld [vmem:[%s455_s9] sm:$0x7]  ;;  %v477_v19 = vld [vmem:[%s444_s27 + $0x8] sm:$0xff]  ;;  %v559_v42 = vstv %s558_s15  ;;  %s2007_s16 = sld [smem:[#allocation7 + $0x4]] }
  0x78   : > { %v519_v20 = vrot.slane %v481_v16, %v506_v11  ;;  %v523_v21 = vrot.slane %v481_v16, %v510_v12  ;;  %v527_v22 = vrot.slane %v481_v16, %v514_v13  ;;  %v1887_v23 = vrot.slane %v480_v17, %v506_v11  ;;  %s2009_s19 = sld [smem:[#allocation7 + $0x5]] }
  0x79   : > { %v1889_v24 = vrot.slane %v480_v17, %v510_v12  ;;  %v1891_v25 = vrot.slane %v480_v17, %v514_v13  ;;  %s2015_s13 = sld [smem:[#allocation7 + $0x6]] }
  0x7a   : > { %2460 = sst [smem:[#allocation25_spill]] %s1993_s14 }
  0x7b   : > { %499 = vperm.xlu1 %1543, %v479_v18   ;;  %489 = vperm.xlu0 %1542, %v477_v19   ;;  %2461 = sst [smem:[#allocation26_spill]] %s1997_s18 }
  0x7c   : > { %s2019_s20 = sld [smem:[#allocation7 + $0x7]] }
  0x7d   : > { %s2025_s27 = sld [smem:[#allocation7 + $0x8]] }
  0x7e   : > { %s2027_s28 = sld [smem:[#allocation7 + $0x9]] }
  0x7f   : > { %716 = vperm.xlu1 %1543, %v703_v26   ;;  %711 = vperm.xlu0 %1542, %v702_v27   ;;  %s2032_s30 = sld [smem:[#allocation7 + $0xa]] }
  0x80   : > { %s2035_s9 = sld [smem:[#allocation7 + $0xb]] }
  0x81   : > { %s2039_s15 = sld [smem:[#allocation7 + $0xc]] }
  0x82   : > { %2462 = sst [smem:[#allocation27_spill]] %s2019_s20 }
  0x83   : > { %726 = vperm.xlu1 %1543, %v705_v28   ;;  %721 = vperm.xlu0 %1542, %v704_v29   ;;  %v1708_v29 = vmov 1966171168   ;;  %s2041_s0 = sld [smem:[#allocation7 + $0xd]] }
  0x84   : > { %s2045_s1 = sld [smem:[#allocation7 + $0xe]] }
  0x85   : > { %s2049_s2 = sld [smem:[#allocation7 + $0xf]] }
  0x86   : > { %s2051_s3 = sld [smem:[#allocation7 + $0x10]] }
  0x87   : > { %856 = vperm.xlu1 %1543, %v1392_v30   ;;  %851 = vperm.xlu0 %1542, %v1391_v31   ;;  %v648_v30 = vunpack.c.l.s4 %v1708_v29  ;;  %s2056_s4 = sld [smem:[#allocation9]] }
  0x88   : > { %s2063_s5 = sld [smem:[#allocation7 + $0x11]] }
  0x89   : > { %v649_v35 = vunpack.c.0.s8 %v648_v30  ;;  %s2065_s29 = sld [smem:[#allocation9 + $0x1]] }
  0x8a   : > { %s2067_s25 = sld [smem:[#allocation7 + $0x12]] }
  0x8b   : > { %866 = vperm.xlu1 %1543, %v1394_v32   ;;  %861 = vperm.xlu0 %1542, %v1393_v33   ;;  %s2070_s10 = sld [smem:[#allocation9 + $0x2]] }
  0x8c   : > { %2463 = sst [smem:[#allocation28_spill]] %s2051_s3 }
  0x8d   : > { %s2073_s23 = sld [smem:[#allocation7 + $0x13]] }
  0x8e   : > { %s2075_s22 = sld [smem:[#allocation9 + $0x3]] }
  0x8f   : > { %s2077_s26 = sld [smem:[#allocation7 + $0x14]] }
  0x90   : > { %s2079_s11 = sld [smem:[#allocation9 + $0x4]] }
  0x91   : > { %s2083_s21 = sld [smem:[#allocation7 + $0x15]] }
  0x92   : > { %s2085_s8 = sld [smem:[#allocation9 + $0x5]] }
  0x93   : > { %s2089_s6 = sld [smem:[#allocation7 + $0x16]] }
  0x94   : > { %s2093_s24 = sld [smem:[#allocation9 + $0x6]] }
  0x95   : > { %s2099_s7 = sld [smem:[#allocation7 + $0x17]] }
  0x9a   : > { %2464 = sst [smem:[#allocation29_spill]] %s2093_s24 }
  0xf2   : > { %v495_v36 = vpop.permute.xlu1 %494  ;;  %v485_v37 = vpop.permute.xlu0 %484 }
  0xf3   : > { %v540_v38 = vsub.f32 %v495_v36, %v519_v20  ;;  %v541_v39 = vsub.f32 %v495_v36, %v523_v21  ;;  %v542_v40 = vsub.f32 %v495_v36, %v527_v22  ;;  %v534_v41 = vsub.f32 %v485_v37, %v1887_v23 }
  0xf4   : > { %v535_v43 = vsub.f32 %v485_v37, %v1889_v24  ;;  %v536_v44 = vsub.f32 %v485_v37, %v1891_v25 }
  0xf5   : > { %v552_v45 = vmul.f32 %v540_v38, %v540_v38  ;;  %v553_v46 = vmul.f32 %v541_v39, %v541_v39  ;;  %v554_v47 = vmul.f32 %v542_v40, %v542_v40  ;;  %v546_v48 = vmul.f32 %v534_v41, %v534_v41 }
  0xf6   : > { %v547_v49 = vmul.f32 %v535_v43, %v535_v43  ;;  %v548_v50 = vmul.f32 %v536_v44, %v536_v44  ;;  %v500_v51 = vpop.permute.xlu1 %499  ;;  %v490_v60 = vpop.permute.xlu0 %489  ;;  %v1934_v41 = vsub.s32 %v649_v35, %v1876_v10 }
  0xf7   : > { %v566_v52 = vmul.f32 %v559_v42, %v552_v45  ;;  %v567_v53 = vmul.f32 %v559_v42, %v553_v46  ;;  %v568_v54 = vmul.f32 %v559_v42, %v554_v47  ;;  %v560_v55 = vmul.f32 %v559_v42, %v546_v48 }
  0xf8   : > { %v561_v56 = vmul.f32 %v559_v42, %v547_v49  ;;  %v562_v57 = vmul.f32 %v559_v42, %v548_v50  ;;  %v543_v58 = vsub.f32 %v500_v51, %v519_v20  ;;  %v544_v59 = vsub.f32 %v500_v51, %v523_v21 }
  0xf9   : > { %v584_v61 = vmul.f32 1.442695, %v566_v52  ;;  %v586_v62 = vmul.f32 1.442695, %v567_v53  ;;  %v588_v63 = vmul.f32 1.442695, %v568_v54  ;;  %v545_v0 = vsub.f32 %v500_v51, %v527_v22 }
  0xfa   : > { %v572_v1 = vmul.f32 1.442695, %v560_v55  ;;  %v574_v2 = vmul.f32 1.442695, %v561_v56  ;;  %v576_v3 = vmul.f32 1.442695, %v562_v57  ;;  %v555_v4 = vmul.f32 %v543_v58, %v543_v58  ;;  %v1923_v15 = vpop.permute.xlu1 %716 }
  0xfb   : > { %1544 = vpow2.f32 %v584_v61  ;;  %v556_v5 = vmul.f32 %v544_v59, %v544_v59  ;;  %v557_v6 = vmul.f32 %v545_v0, %v545_v0  ;;  %v537_v7 = vsub.f32 %v490_v60, %v1887_v23 }
  0xfc   : > { %1546 = vpow2.f32 %v586_v62  ;;  %v569_v8 = vmul.f32 %v559_v42, %v555_v4  ;;  %v538_v9 = vsub.f32 %v490_v60, %v1889_v24  ;;  %v539_v11 = vsub.f32 %v490_v60, %v1891_v25  ;;  %v712_v25 = vpop.permute.xlu0 %711 }
  0xfd   : > { %1548 = vpow2.f32 %v588_v63  ;;  %v570_v12 = vmul.f32 %v559_v42, %v556_v5  ;;  %v571_v13 = vmul.f32 %v559_v42, %v557_v6  ;;  %v549_v14 = vmul.f32 %v537_v7, %v537_v7 }
  0xfe   : > { %1550 = vpow2.f32 %v572_v1  ;;  %v590_v16 = vmul.f32 1.442695, %v569_v8  ;;  %v550_v17 = vmul.f32 %v538_v9, %v538_v9  ;;  %v551_v18 = vmul.f32 %v539_v11, %v539_v11  ;;  %v727_v28 = vpop.permute.xlu1 %726 }
  0xff   : > { %1552 = vpow2.f32 %v574_v2  ;;  %v592_v19 = vmul.f32 1.442695, %v570_v12  ;;  %v594_v20 = vmul.f32 1.442695, %v571_v13  ;;  %v563_v21 = vmul.f32 %v559_v42, %v549_v14 }
 0x100   : > { %1554 = vpow2.f32 %v576_v3  ;;  %v564_v22 = vmul.f32 %v559_v42, %v550_v17  ;;  %v565_v23 = vmul.f32 %v559_v42, %v551_v18  ;;  %v722_v31 = vpop.permute.xlu0 %721 }
 0x101   : > { %1556 = vpow2.f32 %v590_v16  ;;  %v578_v24 = vmul.f32 1.442695, %v563_v21 }
 0x102   : > { %1558 = vpow2.f32 %v592_v19  ;;  %v580_v26 = vmul.f32 1.442695, %v564_v22  ;;  %v582_v27 = vmul.f32 1.442695, %v565_v23  ;;  %v1929_v36 = vpop.permute.xlu1 %856 }
 0x103   : > { %1560 = vpow2.f32 %v594_v20 }
 0x104   : > { %1562 = vpow2.f32 %v578_v24  ;;  %v852_v45 = vpop.permute.xlu0 %851 }
 0x105   : > { %1564 = vpow2.f32 %v580_v26 }
 0x106   : > { %1566 = vpow2.f32 %v582_v27  ;;  %v1950_v55 = vpop.permute.xlu1 %866 }
 0x108   : > { %v1925_v32 = vpop.eup %1544 }
 0x109   : > { %v1927_v33 = vpop.eup %1546  ;;  %v735_v42 = vmul.f32 %v1925_v32, %v722_v31 }
 0x10a   : > { %v1931_v37 = vpop.eup %1548  ;;  %v736_v43 = vmul.f32 %v1927_v33, %v722_v31 }
 0x10b   : > { %v1551_v38 = vpop.eup %1550  ;;  %v1939_v44 = vmul.f32 %v1931_v37, %v722_v31 }
 0x10c   : > { %v1553_v39 = vpop.eup %1552  ;;  %v729_v47 = vmul.f32 %v1551_v38, %v712_v25  ;;  %v1941_v49 = vmul.f32 %v1551_v38, %v852_v45 }
 0x10d   : > { %v1555_v40 = vpop.eup %1554  ;;  %v730_v48 = vmul.f32 %v1553_v39, %v712_v25  ;;  %v1943_v50 = vmul.f32 %v1553_v39, %v852_v45 }
 0x10e   : > { %v1557_v46 = vpop.eup %1556  ;;  %v1946_v10 = vmul.f32 %v1555_v40, %v712_v25  ;;  %v1948_v54 = vmul.f32 %v1555_v40, %v852_v45 }
 0x10f   : > { %v1559_v51 = vpop.eup %1558  ;;  %v619_v52 = vadd.f32 %v1557_v46, %v1925_v32  ;;  %v738_v53 = vmul.f32 %v1557_v46, %v727_v28  ;;  %v1956_v59 = vmul.f32 %v1557_v46, %v1950_v55 }
 0x110   : > { %v1952_v56 = vpop.eup %1560  ;;  %v626_v57 = vadd.f32 %v1559_v51, %v1927_v33  ;;  %v739_v58 = vmul.f32 %v1559_v51, %v727_v28  ;;  %v1959_v60 = vmul.f32 %v1559_v51, %v1950_v55 }
 0x111   : > { %v1961_v61 = vpop.eup %1562  ;;  %v620_v62 = vrot.slane %v619_v52, 4  ;;  %v633_v63 = vadd.f32 %v1952_v56, %v1931_v37  ;;  %v1966_v0 = vmul.f32 %v1952_v56, %v727_v28  ;;  %v1968_v1 = vadd.f32 %v738_v53, %v735_v42 }
 0x112   : > { %v1970_v2 = vpop.eup %1564  ;;  %v627_v3 = vrot.slane %v626_v57, 4  ;;  %v598_v4 = vadd.f32 %v1961_v61, %v1551_v38  ;;  %v732_v5 = vmul.f32 %v1961_v61, %v1923_v15  ;;  %v1975_v6 = vadd.f32 %v739_v58, %v736_v43 }
 0x113   : > { %v1977_v7 = vpop.eup %1566  ;;  %v621_v8 = vadd.f32 %v620_v62, %v619_v52  ;;  %v634_v9 = vrot.slane %v633_v63, 4  ;;  %v605_v11 = vadd.f32 %v1970_v2, %v1553_v39  ;;  %v733_v12 = vmul.f32 %v1970_v2, %v1923_v15 }
 0x114   : > { %v628_v13 = vadd.f32 %v627_v3, %v626_v57  ;;  %v599_v14 = vrot.slane %v598_v4, 4  ;;  %v612_v16 = vadd.f32 %v1977_v7, %v1555_v40  ;;  %v734_v17 = vmul.f32 %v1977_v7, %v1923_v15 }
 0x115   : > { %v622_v18 = vrot.slane %v621_v8, 2  ;;  %v635_v19 = vadd.f32 %v634_v9, %v633_v63  ;;  %v606_v20 = vrot.slane %v605_v11, 4  ;;  %v741_v21 = vadd.f32 %v732_v5, %v729_v47 }
 0x116   : > { %v629_v22 = vrot.slane %v628_v13, 2  ;;  %v600_v23 = vadd.f32 %v599_v14, %v598_v4  ;;  %v613_v24 = vrot.slane %v612_v16, 4  ;;  %v748_v25 = vadd.f32 %v733_v12, %v730_v48 }
 0x117   : > { %v623_v26 = vadd.f32 %v622_v18, %v621_v8  ;;  %v636_v27 = vrot.slane %v635_v19, 2  ;;  %v607_v28 = vadd.f32 %v606_v20, %v605_v11  ;;  %v742_v29 = vrot.slane %v741_v21, 4 }
 0x118   : > { %v630_v30 = vadd.f32 %v629_v22, %v628_v13  ;;  %v601_v31 = vrot.slane %v600_v23, 2  ;;  %v614_v35 = vadd.f32 %v613_v24, %v612_v16  ;;  %v749_v38 = vrot.slane %v748_v25, 4 }
 0x119   : > { %v624_v39 = vrot.slane %v623_v26, 1  ;;  %v637_v40 = vadd.f32 %v636_v27, %v635_v19  ;;  %v608_v42 = vrot.slane %v607_v28, 2  ;;  %v743_v15 = vadd.f32 %v742_v29, %v741_v21 }
 0x11a   : > { %v631_v43 = vrot.slane %v630_v30, 1  ;;  %v602_v45 = vadd.f32 %v601_v31, %v600_v23  ;;  %v615_v46 = vrot.slane %v614_v35, 2  ;;  %v750_v47 = vadd.f32 %v749_v38, %v748_v25  ;;  %v597_v31 = vld [vmem:[#allocation2 + $0x3] sm:$0x7] }
 0x11b   : > { %v625_v51 = vadd.f32 %v624_v39, %v623_v26  ;;  %v638_v52 = vrot.slane %v637_v40, 1  ;;  %v609_v53 = vadd.f32 %v608_v42, %v607_v28  ;;  %v744_v48 = vrot.slane %v743_v15, 2 }
 0x11c   : > { %v632_v57 = vadd.f32 %v631_v43, %v630_v30  ;;  %v603_v58 = vrot.slane %v602_v45, 1  ;;  %v616_v62 = vadd.f32 %v615_v46, %v614_v35  ;;  %v751_v63 = vrot.slane %v750_v47, 2 }
 0x11d   : > { %v639_v3 = vadd.f32 %v638_v52, %v637_v40  ;;  %v610_v4 = vrot.slane %v609_v53, 1  ;;  %v745_v5 = vadd.f32 %v744_v48, %v743_v15  ;;  %v755_v8 = vadd.f32 %v734_v17, %v1946_v10 }
 0x11e   : > { %v669_v9 = vcombine.low %v625_v51, %v632_v57  ;;  %v604_v11 = vadd.f32 %v603_v58, %v602_v45  ;;  %v617_v12 = vrot.slane %v616_v62, 1  ;;  %v752_v13 = vadd.f32 %v751_v63, %v750_v47  ;;  %v596_v51 = vld [vmem:[#allocation2] sm:$0x7] }
 0x11f   : > { %v683_v14 = vrot.slane %v639_v3, %v1934_v41  ;;  %v611_v16 = vadd.f32 %v610_v4, %v609_v53  ;;  %v746_v18 = vrot.slane %v745_v5, 1  ;;  %v756_v19 = vrot.slane %v755_v8, 4 }
 0x120   : > { %v676_v20 = vrot.slane %v669_v9, %v1934_v41  ;;  %v618_v21 = vadd.f32 %v617_v12, %v616_v62  ;;  %v753_v22 = vrot.slane %v752_v13, 1  ;;  %v763_v23 = vrot.slane %v1968_v1, 4 }
 0x121   : > { %v646_v24 = vcombine.low %v604_v11, %v611_v16  ;;  %v747_v25 = vadd.f32 %v746_v18, %v745_v5  ;;  %v757_v10 = vadd.f32 %v756_v19, %v755_v8  ;;  %v770_v17 = vrot.slane %v1975_v6, 4 }
 0x122   : > { %v684_v26 = vcombine.low %v676_v20, %v683_v14  ;;  %v660_v27 = vrot.slane %v618_v21, %v1934_v41  ;;  %v754_v28 = vadd.f32 %v753_v22, %v752_v13  ;;  %v764_v29 = vadd.f32 %v763_v23, %v1968_v1  ;;  %v707_v22 = vld [vmem:[#allocation2 + $0x6] sm:$0x7] }
 0x123   : > { %v653_v30 = vrot.slane %v646_v24, %v1934_v41  ;;  %v758_v35 = vrot.slane %v757_v10, 2  ;;  %v771_v38 = vadd.f32 %v770_v17, %v1975_v6  ;;  %v776_v39 = vadd.f32 %v1966_v0, %v1939_v44 }
 0x124   : > { %v691_v40 = vrot.slane %v684_v26, %v1934_v41  ;;  %v789_v42 = vcombine.low %v747_v25, %v754_v28  ;;  %v765_v15 = vrot.slane %v764_v29, 2  ;;  %v872_v1 = vmul.f32 %v1961_v61, %v1929_v36 }
 0x125   : > { %v661_v43 = vcombine.low %v653_v30, %v660_v27  ;;  %v759_v45 = vadd.f32 %v758_v35, %v757_v10  ;;  %v772_v46 = vrot.slane %v771_v38, 2  ;;  %v777_v47 = vrot.slane %v776_v39, 4 }
 0x126   : > { %v695_v6 = vadd.f32 %v691_v40, %v597_v31  ;;  %v796_v44 = vrot.slane %v789_v42, %v1934_v41  ;;  %v766_v0 = vadd.f32 %v765_v15, %v764_v29  ;;  %v873_v52 = vmul.f32 %v1970_v2, %v1929_v36  ;;  %v708_v42 = vld [vmem:[#allocation2 + $0x9] sm:$0x7] }
 0x127   : > { %v668_v53 = vrot.slane %v661_v43, %v1934_v41  ;;  %v760_v61 = vrot.slane %v759_v45, 1  ;;  %v773_v48 = vadd.f32 %v772_v46, %v771_v38  ;;  %v778_v57 = vadd.f32 %v777_v47, %v776_v39 }
 0x128   : > { %701 = vst.msk [vmem:[#allocation2 + $0x3] sm:$0x7] %vm1901_vm0, %v695_v6  ;;  %v767_v58 = vrot.slane %v766_v0, 1  ;;  %v874_v62 = vmul.f32 %v1977_v7, %v1929_v36  ;;  %v881_v63 = vadd.f32 %v872_v1, %v1941_v49  ;;  %v888_v2 = vadd.f32 %v873_v52, %v1943_v50  ;;  %v862_v7 = vpop.permute.xlu0 %861 }
 0x129   : > { %v694_v3 = vadd.f32 %v668_v53, %v596_v51  ;;  %v761_v4 = vadd.f32 %v760_v61, %v759_v45  ;;  %v774_v5 = vrot.slane %v773_v48, 1  ;;  %v779_v8 = vrot.slane %v778_v57, 2 }
 0x12a   : > { %v768_v9 = vadd.f32 %v767_v58, %v766_v0  ;;  %v882_v11 = vrot.slane %v881_v63, 4  ;;  %v889_v12 = vrot.slane %v888_v2, 4  ;;  %v895_v13 = vadd.f32 %v874_v62, %v1948_v54 }
 0x12b   : > { %700 = vst.msk [vmem:[#allocation2] sm:$0x7] %vm1901_vm0, %v694_v3  ;;  %v803_v36 = vrot.slane %v761_v4, %v1934_v41  ;;  %v775_v49 = vadd.f32 %v774_v5, %v773_v48  ;;  %v780_v50 = vadd.f32 %v779_v8, %v778_v57  ;;  %v875_v16 = vmul.f32 %v1925_v32, %v862_v7 }
 0x12c   : > { %v883_v14 = vadd.f32 %v882_v11, %v881_v63  ;;  %v876_v18 = vmul.f32 %v1927_v33, %v862_v7  ;;  %v890_v21 = vadd.f32 %v889_v12, %v888_v2  ;;  %v896_v23 = vrot.slane %v895_v13, 4 }
 0x12d   : > { %v804_v54 = vcombine.low %v796_v44, %v803_v36  ;;  %v781_v19 = vrot.slane %v780_v50, 1  ;;  %v812_v20 = vcombine.low %v768_v9, %v775_v49  ;;  %v902_v24 = vadd.f32 %v1956_v59, %v875_v16 }
 0x12e   : > { %v909_v25 = vadd.f32 %v1959_v60, %v876_v18  ;;  %v884_v26 = vrot.slane %v883_v14, 2  ;;  %v891_v27 = vrot.slane %v890_v21, 2  ;;  %v897_v29 = vadd.f32 %v896_v23, %v895_v13  ;;  %v847_v23 = vld [vmem:[#allocation2 + $0xc] sm:$0x7] }
 0x12f   : > { %v811_v32 = vrot.slane %v804_v54, %v1934_v41  ;;  %v782_v10 = vadd.f32 %v781_v19, %v780_v50  ;;  %v819_v33 = vrot.slane %v812_v20, %v1934_v41  ;;  %v903_v60 = vrot.slane %v902_v24, 4  ;;  %v2105_v19 = vld [vmem:[#allocation2 + $0x3] sm:$0x7] }
 0x130   : > { %v910_v30 = vrot.slane %v909_v25, 4  ;;  %v880_v35 = vmul.f32 %v1952_v56, %v1950_v55  ;;  %v885_v39 = vadd.f32 %v884_v26, %v883_v14  ;;  %v877_v40 = vmul.f32 %v1931_v37, %v862_v7 }
 0x131   : > { %v837_v17 = vadd.f32 %v811_v32, %v707_v22  ;;  %v826_v59 = vrot.slane %v782_v10, %v1934_v41  ;;  %v892_v15 = vadd.f32 %v891_v27, %v890_v21  ;;  %v898_v1 = vrot.slane %v897_v29, 2 }
 0x132   : > { %v2053_v28 = vld [vmem:[#allocation2] sm:$0x7]  ;;  %v904_v43 = vadd.f32 %v903_v60, %v902_v24  ;;  %v911_v45 = vadd.f32 %v910_v30, %v909_v25  ;;  %v886_v56 = vrot.slane %v885_v39, 1  ;;  %v916_v46 = vadd.f32 %v880_v35, %v877_v40 }
 0x133   : > { %v986_v31 = vadd.f32 1e-08, %v2053_v28  ;;  %839 = vst.msk [vmem:[#allocation2 + $0x6] sm:$0x7] %vm1901_vm0, %v837_v17  ;;  %v827_v38 = vcombine.low %v819_v33, %v826_v59  ;;  %v893_v47 = vrot.slane %v892_v15, 1  ;;  %v899_v51 = vadd.f32 %v898_v1, %v897_v29 }
 0x134   : > { %v905_v6 = vrot.slane %v904_v43, 2  ;;  %v912_v44 = vrot.slane %v911_v45, 2  ;;  %v887_v0 = vadd.f32 %v886_v56, %v885_v39  ;;  %v917_v52 = vrot.slane %v916_v46, 4 }
 0x135   : > { %1568 = vrcp.f32 %v986_v31  ;;  %v834_v55 = vrot.slane %v827_v38, %v1934_v41  ;;  %v894_v53 = vadd.f32 %v893_v47, %v892_v15  ;;  %v900_v61 = vrot.slane %v899_v51, 1 }
 0x136   : > { %v906_v48 = vadd.f32 %v905_v6, %v904_v43  ;;  %v913_v57 = vadd.f32 %v912_v44, %v911_v45  ;;  %v918_v58 = vadd.f32 %v917_v52, %v916_v46  ;;  %v999_v4 = vstv %s1989_s17 }
 0x137   : > { %v838_v37 = vadd.f32 %v834_v55, %v708_v42  ;;  %v901_v62 = vadd.f32 %v900_v61, %v899_v51  ;;  %v929_v63 = vcombine.low %v887_v0, %v894_v53  ;;  %v1024_v5 = vstv %s1993_s14  ;;  %s2103_s14 = sld [smem:[#allocation9 + $0x7]] }
 0x138   : > { %v907_v2 = vrot.slane %v906_v48, 1  ;;  %v914_v3 = vrot.slane %v913_v57, 1  ;;  %v919_v8 = vrot.slane %v918_v58, 2  ;;  %v1050_v36 = vstv %s1997_s18 }
 0x139   : > { %840 = vst.msk [vmem:[#allocation2 + $0x9] sm:$0x7] %vm1901_vm0, %v838_v37  ;;  %v936_v9 = vrot.slane %v929_v63, %v1934_v41  ;;  %v943_v11 = vrot.slane %v901_v62, %v1934_v41  ;;  %v1076_v49 = vstv %s2003_s12  ;;  %v1102_v50 = vstv %s2007_s16 }
 0x13a   : > { %v908_v12 = vadd.f32 %v907_v2, %v906_v48  ;;  %v915_v13 = vadd.f32 %v914_v3, %v913_v57  ;;  %v2421_v7 = vstv %s2009_s19  ;;  %v2420_v14 = vstv %s2015_s13  ;;  %v990_v60 = vld [vmem:[#allocation2 + $0x6] sm:$0x7] }
 0x13b   : > { %v1180_v16 = vstv %s2019_s20  ;;  %v944_v18 = vcombine.low %v936_v9, %v943_v11  ;;  %v1003_v20 = vstv %s2025_s27  ;;  %v1028_v21 = vstv %s2027_s28 }
 0x13c   : > { %v952_v54 = vcombine.low %v908_v12, %v915_v13  ;;  %v1054_v22 = vstv %s2032_s30  ;;  %v920_v24 = vadd.f32 %v919_v8, %v918_v58  ;;  %v1080_v32 = vstv %s2035_s9 }
 0x13d   : > { %2465 = sst [smem:[#allocation30_spill]] %s2103_s14  ;;  %v1106_v10 = vstv %s2039_s15  ;;  %v951_v33 = vrot.slane %v944_v18, %v1934_v41  ;;  %v1132_v26 = vstv %s2041_s0  ;;  %v1158_v27 = vstv %s2045_s1 }
 0x13e   : > { %v959_v17 = vrot.slane %v952_v54, %v1934_v41  ;;  %v1184_v59 = vstv %s2049_s2  ;;  %v1009_v29 = vstv %s2051_s3  ;;  %v987_v30 = vadd.f32 1e-08, %v2105_v19  ;;  %s2467_s3 = sld [smem:[#allocation24_spill]] }
 0x13f   : > { %v977_v31 = vadd.f32 %v951_v33, %v847_v23  ;;  %v1015_v35 = vstv %s2056_s4  ;;  %v1034_v38 = vstv %s2063_s5  ;;  %v1040_v40 = vstv %s2065_s29  ;;  %s2474_s0 = sld [smem:[#allocation17_spill]] }
 0x140   : > { %v1060_v42 = vstv %s2067_s25  ;;  %v921_v15 = vrot.slane %v920_v24, 1  ;;  %v1066_v1 = vstv %s2070_s10  ;;  %v1086_v43 = vstv %s2073_s23  ;;  %s2478_s25 = sld [smem:[#allocation37_spill]] }
 0x141   : > { %979 = vst.msk [vmem:[#allocation2 + $0xc] sm:$0x7] %vm1901_vm0, %v977_v31  ;;  %v1092_v45 = vstv %s2075_s22  ;;  %v1112_v55 = vstv %s2077_s26  ;;  %v1118_v56 = vstv %s2079_s11  ;;  %v1138_v46 = vstv %s2083_s21  ;;  %s2480_s4 = sld [smem:[#allocation21_spill]] }
 0x142   : > { %v1569_v25 = vpop.eup %1568  ;;  %v1144_v47 = vstv %s2085_s8  ;;  %v1164_v51 = vstv %s2089_s6  ;;  %1570 = vrcp.f32 %v987_v30  ;;  %v1170_v6 = vstv %s2093_s24  ;;  %s2477_s6 = sld [smem:[#allocation24_spill]]  ;;  %s1709_s8 = smov [#allocation10]  }
 0x143   : > { %v992_v39 = vmul.f32 %v1569_v25, %v990_v60  ;;  %v1190_v44 = vstv %s2099_s7  ;;  %v1196_v37 = vstv %s2103_s14  ;;  %v1000_v0 = vmul.f32 %v999_v4, %v2053_v28  ;;  %s1621_s10 = sshll.u32 %s1709_s8, 4  ;;  %s1622_s10 = int_to_ptr.vmem [resolvable:$false] %s1621_s10 }
 0x144   : > { %v922_v61 = vadd.f32 %v921_v15, %v920_v24  ;;  %v1025_v48 = vmul.f32 %v1024_v5, %v2053_v28  ;;  %v1051_v63 = vmul.f32 %v1050_v36, %v2053_v28  ;;  %v1077_v9 = vmul.f32 %v1076_v49, %v2053_v28  ;;  %s1448_s20 = smul.u32 48, %s2467_s3  ;;  %s1623_s11 = scalar_lea.vmem %s1622_s10, 1536 }
 0x145   : > { %v1004_v52 = vmul.f32 %v1003_v20, %v992_v39  ;;  %v1029_v53 = vmul.f32 %v1028_v21, %v992_v39  ;;  %v1055_v57 = vmul.f32 %v1054_v22, %v992_v39  ;;  %v1081_v58 = vmul.f32 %v1080_v32, %v992_v39  ;;  %s1450_s1 = smul.u32 768, %s2474_s0 }
 0x146   : > { %v1107_v62 = vmul.f32 %v1106_v10, %v992_v39  ;;  %v1133_v2 = vmul.f32 %v1132_v26, %v992_v39  ;;  %v1159_v3 = vmul.f32 %v1158_v27, %v992_v39  ;;  %v1185_v8 = vmul.f32 %v1184_v59, %v992_v39  ;;  %s2211_s3 = scalar_lea.vmem [#allocation10], %s1448_s20  ;;  %s2479_s7 = smov %s2478_s25 }
 0x147   : > { %v1103_v11 = vmul.f32 %v1102_v50, %v2053_v28  ;;  %v1129_v12 = vmul.f32 %v2421_v7, %v2053_v28  ;;  %v1155_v13 = vmul.f32 %v2420_v14, %v2053_v28  ;;  %v1181_v18 = vmul.f32 %v1180_v16, %v2053_v28  ;;  %s1222_s23 = sshll.u32 %s2211_s3, 4  ;;  %s2308_s26 = scalar_lea.hbm %s2478_s25, %s1450_s1  ;;  %s2318_s23 = int_to_ptr.vmem [resolvable:$true] %s1222_s23 }
 0x148   : > { %v1006_v54 = vadd.f32 %v1004_v52, %v1000_v0  ;;  %v1031_v23 = vadd.f32 %v1029_v53, %v1025_v48  ;;  %v994_v24 = vld [vmem:[#allocation2 + $0xc] sm:$0x7]  ;;  %v966_v33 = vrot.slane %v922_v61, %v1934_v41  ;;  %v1057_v60 = vadd.f32 %v1055_v57, %v1051_v63  ;;  %s1206_s22 = scalar_lea.sflag [#allocation5], %s2477_s6  ;;  %s1617_s29 = scalar_lea.vmem %s2318_s23, 768 }
 0x149   : > { %v1083_v30 = vadd.f32 %v1081_v58, %v1077_v9  ;;  %v1109_v31 = vadd.f32 %v1107_v62, %v1103_v11  ;;  %v996_v39 = vmul.f32 %v1569_v25, %v994_v24  ;;  %v1135_v15 = vadd.f32 %v1133_v2, %v1129_v12  ;;  %p1618_p3 = scmp.ne.s32.totalorder %s2318_s23, %s1617_s29  ;;  %p2481_p6 = scmp.ne.s32.totalorder %s2480_s4, 0 }
 0x14a   : > { %v1161_v14 = vadd.f32 %v1159_v3, %v1155_v13  ;;  %v1187_v7 = vadd.f32 %v1185_v8, %v1181_v18  ;;  %v967_v28 = vcombine.low %v959_v17, %v966_v33  ;;  %p1624_p9 = scmp.lt.s32.totalorder %s2318_s23, %s1622_s10  ;;  %p1625_p10 = scmp.lt.s32.totalorder %s1623_s11, %s1617_s29 }
 0x14b   : > { %v1010_v0 = vmul.f32 %v1009_v29, %v996_v39  ;;  %v1035_v52 = vmul.f32 %v1034_v38, %v996_v39  ;;  %v1061_v53 = vmul.f32 %v1060_v42, %v996_v39  ;;  %v1087_v61 = vmul.f32 %v1086_v43, %v996_v39  ;;  %p1619_p8 = pnand %p1618_p3, %p2481_p6 }
 0x14c   : > { %v1113_v48 = vmul.f32 %v1112_v55, %v996_v39  ;;  %v1139_v25 = vmul.f32 %v1138_v46, %v996_v39  ;;  %v1165_v57 = vmul.f32 %v1164_v51, %v996_v39  ;;  %v1191_v17 = vmul.f32 %v1190_v44, %v996_v39  ;;  %v848_v39 = vld [vmem:[#allocation2 + $0xf] sm:$0x7]  ;;  %p1626_p0 = por %p1625_p10, %p1624_p9 }
 0x14d   : > { %v1012_v58 = vadd.f32 %v1010_v0, %v1006_v54  ;;  %v1037_v62 = vadd.f32 %v1035_v52, %v1031_v23  ;;  %v1063_v63 = vadd.f32 %v1061_v53, %v1057_v60  ;;  %v1089_v2 = vadd.f32 %v1087_v61, %v1083_v30  ;;  %p1620_p7 = pneg %p1619_p8 }
 0x14e   : > { %v1115_v3 = vadd.f32 %v1113_v48, %v1109_v31  ;;  %v1141_v8 = vadd.f32 %v1139_v25, %v1135_v15  ;;  %v1167_v9 = vadd.f32 %v1165_v57, %v1161_v14  ;;  %v1193_v11 = vadd.f32 %v1191_v17, %v1187_v7 }
 0x14f   : > { %v1016_v12 = vadd.f32 %v1015_v35, %v1012_v58  ;;  %v1041_v13 = vadd.f32 %v1040_v40, %v1037_v62  ;;  %v1067_v18 = vadd.f32 %v1066_v1, %v1063_v63  ;;  %v1093_v24 = vadd.f32 %v1092_v45, %v1089_v2  ;;  %v1571_v33 = vpop.eup %1570  ;;  %p1627_p11 = pnand %p1626_p0, %p1620_p7 }
 0x150   : > { %v1119_v54 = vadd.f32 %v1118_v56, %v1115_v3  ;;  %v1145_v23 = vadd.f32 %v1144_v47, %v1141_v8  ;;  %v1171_v60 = vadd.f32 %v1170_v6, %v1167_v9  ;;  %v1197_v14 = vadd.f32 %v1196_v37, %v1193_v11 }
 0x151   : > { %v974_v7 = vrot.slane %v967_v28, %v1934_v41  ;;  %1018 = vst.msk [vmem:[%s2211_s3] ss:$8 sm:$0x7] %vm1901_vm0, %v1016_v12  ;;  %1402 = vst.msk [vmem:[%s2211_s3 + $0x1] ss:$8 sm:$0x7] %vm1901_vm0, %v1041_v13  ;;  %v1001_v28 = vmul.f32 %v999_v4, %v2105_v19  ;;  %v1052_v4 = vmul.f32 %v1050_v36, %v2105_v19 }
 0x152   : > { %1408 = vst.msk [vmem:[%s2211_s3 + $0x2] ss:$8 sm:$0x7] %vm1901_vm0, %v1067_v18  ;;  %1414 = vst.msk [vmem:[%s2211_s3 + $0x3] ss:$8 sm:$0x7] %vm1901_vm0, %v1093_v24 }
 0x153   : > { %1420 = vst.msk [vmem:[%s2211_s3 + $0x4] ss:$8 sm:$0x7] %vm1901_vm0, %v1119_v54  ;;  %1426 = vst.msk [vmem:[%s2211_s3 + $0x5] ss:$8 sm:$0x7] %vm1901_vm0, %v1145_v23  ;;  %v978_v30 = vadd.f32 %v974_v7, %v848_v39 }
 0x154   : > { %1432 = vst.msk [vmem:[%s2211_s3 + $0x6] ss:$8 sm:$0x7] %vm1901_vm0, %v1171_v60  ;;  %1438 = vst.msk [vmem:[%s2211_s3 + $0x7] ss:$8 sm:$0x7] %vm1901_vm0, %v1197_v14 }
 0x155   : > { %v991_v41 = vld [vmem:[#allocation2 + $0x9] sm:$0x7]  ;;  %980 = vst.msk [vmem:[#allocation2 + $0xf] sm:$0x7] %vm1901_vm0, %v978_v30 }
 0x156   : > { %v993_v31 = vmul.f32 %v1571_v33, %v991_v41 }
 0x158   : > { %v1005_v15 = vmul.f32 %v1003_v20, %v993_v31  ;;  %v1030_v0 = vmul.f32 %v1028_v21, %v993_v31  ;;  %v1056_v52 = vmul.f32 %v1054_v22, %v993_v31  ;;  %v1082_v53 = vmul.f32 %v1080_v32, %v993_v31 }
 0x159   : > { %v1108_v61 = vmul.f32 %v1106_v10, %v993_v31  ;;  %v1134_v48 = vmul.f32 %v1132_v26, %v993_v31  ;;  %v1160_v25 = vmul.f32 %v1158_v27, %v993_v31  ;;  %v1186_v57 = vmul.f32 %v1184_v59, %v993_v31 }
 0x15a   : > { %v1026_v20 = vmul.f32 %v1024_v5, %v2105_v19  ;;  %v1078_v21 = vmul.f32 %v1076_v49, %v2105_v19  ;;  %v1104_v22 = vmul.f32 %v1102_v50, %v2105_v19  ;;  %v2472_v32 = vstv %s2009_s19 }
 0x15b   : > { %v1130_v10 = vmul.f32 %v2472_v32, %v2105_v19  ;;  %v2473_v26 = vstv %s2015_s13  ;;  %v1182_v5 = vmul.f32 %v1180_v16, %v2105_v19  ;;  %v1007_v36 = vadd.f32 %v1005_v15, %v1001_v28 }
 0x15c   : > { %v1156_v27 = vmul.f32 %v2473_v26, %v2105_v19  ;;  %v995_v49 = vld [vmem:[#allocation2 + $0xf] sm:$0x7]  ;;  %v1032_v59 = vadd.f32 %v1030_v0, %v1026_v20  ;;  %v1058_v50 = vadd.f32 %v1056_v52, %v1052_v4  ;;  %v1084_v17 = vadd.f32 %v1082_v53, %v1078_v21 }
 0x15d   : > { %v997_v58 = vmul.f32 %v1571_v33, %v995_v49  ;;  %v1110_v62 = vadd.f32 %v1108_v61, %v1104_v22  ;;  %v1136_v63 = vadd.f32 %v1134_v48, %v1130_v10  ;;  %v1188_v3 = vadd.f32 %v1186_v57, %v1182_v5 }
 0x15e   : > { %v1162_v2 = vadd.f32 %v1160_v25, %v1156_v27 }
 0x15f   : > { %v1011_v8 = vmul.f32 %v1009_v29, %v997_v58  ;;  %v1036_v9 = vmul.f32 %v1034_v38, %v997_v58  ;;  %v1062_v16 = vmul.f32 %v1060_v42, %v997_v58  ;;  %v1088_v19 = vmul.f32 %v1086_v43, %v997_v58 }
 0x160   : > { %v1114_v11 = vmul.f32 %v1112_v55, %v997_v58  ;;  %v1140_v12 = vmul.f32 %v1138_v46, %v997_v58  ;;  %v1166_v13 = vmul.f32 %v1164_v51, %v997_v58  ;;  %v1192_v29 = vmul.f32 %v1190_v44, %v997_v58 }
 0x161   : > { %v1013_v38 = vadd.f32 %v1011_v8, %v1007_v36  ;;  %v1038_v42 = vadd.f32 %v1036_v9, %v1032_v59  ;;  %v1064_v18 = vadd.f32 %v1062_v16, %v1058_v50  ;;  %v1090_v43 = vadd.f32 %v1088_v19, %v1084_v17 }
 0x162   : > { %v1116_v24 = vadd.f32 %v1114_v11, %v1110_v62  ;;  %v1142_v55 = vadd.f32 %v1140_v12, %v1136_v63  ;;  %v1168_v46 = vadd.f32 %v1166_v13, %v1162_v2  ;;  %v1194_v51 = vadd.f32 %v1192_v29, %v1188_v3 }
 0x163   : > { %v1017_v44 = vadd.f32 %v1015_v35, %v1013_v38  ;;  %v1042_v33 = vadd.f32 %v1040_v40, %v1038_v42  ;;  %v1068_v39 = vadd.f32 %v1066_v1, %v1064_v18  ;;  %v1094_v54 = vadd.f32 %v1092_v45, %v1090_v43 }
 0x164   : > { %v1120_v23 = vadd.f32 %v1118_v56, %v1116_v24  ;;  %v1146_v60 = vadd.f32 %v1144_v47, %v1142_v55  ;;  %v1172_v35 = vadd.f32 %v1170_v6, %v1168_v46  ;;  %v1198_v40 = vadd.f32 %v1196_v37, %v1194_v51 }
 0x165   : > { %1397 = vst.msk [vmem:[%s2211_s3 + $0x18] ss:$8 sm:$0x7] %vm1901_vm0, %v1017_v44  ;;  %1403 = vst.msk [vmem:[%s2211_s3 + $0x19] ss:$8 sm:$0x7] %vm1901_vm0, %v1042_v33 }
 0x166   : > { %1409 = vst.msk [vmem:[%s2211_s3 + $0x1a] ss:$8 sm:$0x7] %vm1901_vm0, %v1068_v39  ;;  %1415 = vst.msk [vmem:[%s2211_s3 + $0x1b] ss:$8 sm:$0x7] %vm1901_vm0, %v1094_v54 }
 0x167   : > { %1421 = vst.msk [vmem:[%s2211_s3 + $0x1c] ss:$8 sm:$0x7] %vm1901_vm0, %v1120_v23  ;;  %1427 = vst.msk [vmem:[%s2211_s3 + $0x1d] ss:$8 sm:$0x7] %vm1901_vm0, %v1146_v60 }
 0x168   : > { %1433 = vst.msk [vmem:[%s2211_s3 + $0x1e] ss:$8 sm:$0x7] %vm1901_vm0, %v1172_v35  ;;  %1439 = vst.msk [vmem:[%s2211_s3 + $0x1f] ss:$8 sm:$0x7] %vm1901_vm0, %v1198_v40 }
 0x169   : > { %1630 = shalt.err (!%p1627_p11)
}
 0x16a   : > { %s1631_s3 = scalar_lea.hbm %s2308_s26, 768  ;;  %s1635_s18 = scalar_lea.hbm %s2479_s7, 1536 }
 0x16b   : > { %p1632_p2 = scmp.ne.s32.totalorder %s2308_s26, %s1631_s3  ;;  %p1636_p12 = scmp.lt.s32.totalorder %s2308_s26, %s2479_s7 }
 0x16c   : > { %p1637_p1 = scmp.lt.s32.totalorder %s1635_s18, %s1631_s3 }
 0x16d   : > { %p1633_p13 = pnand %p1632_p2, %p2481_p6 }
 0x16e   : > { %p1638_p3 = por %p1637_p1, %p1636_p12 }
 0x16f   : > { %p1634_p4 = pneg %p1633_p13 }
 0x171   : > { %p1639_p8 = pnand %p1638_p3, %p1634_p4 }
 0x173   : > { %1642 = shalt.err (!%p1639_p8)
}
 0x174   : > { %s1710_s19 = smov 384   ;;  %s1711_s13 = smov 24  }
 0x175   : > { %1463 = dma.vmem_to_hbm [thread:$0]  (%p2481_p6), %s2318_s23, 768, %s2308_s26, %s1206_s22, %s1710_s19, %s1710_s19, %s1711_s13  }
 0x176 PF: > { %s2482_s27 = sld [smem:[#allocation14_spill]] }
 0x177   : > { %s2483_s28 = sld [smem:[#allocation23_spill]] }
 0x178   : > { %s2484_s30 = sld [smem:[#allocation19_spill]] }
 0x17c   : > { %s1237_s9 = sand.u32 1, %s2482_s27  }
 0x17d   : > { %p2485_p7 = scmp.ne.s32.totalorder %s2483_s28, 0  ;;  %s1238_s15 = scalar_lea.sflag [#allocation5], %s1237_s9 }
 0x17f   : > { %p1476_p9 = pnand %p1377_p5, %p2485_p7 }
 0x181   : > { %p1477_p10 = pneg %p1476_p9 }
 0x183   : > { %1676 = dma.done.wait (%p1477_p10), %s1238_s15, 768  }
 0x184   : > { %1678 = vsyncadd (%p1477_p10), %s1238_s15, 4294966528  ;;  %s21_s26 = sadd.s32 1, %s2484_s30   ;;  %s2486_s21 = sld [smem:[#allocation15_spill]] }
 0x185   : > { %p18_p0 = scmp.ge.s32.totalorder %s21_s26, 4   ;;  %s2487_s22 = sld [smem:[#allocation16_spill]] }
 0x186   : > { %s2488_s23 = sld [smem:[#allocation22_spill]] }
 0x187   : > { %s2489_s24 = sld [smem:[#allocation18_spill]]  ;;  %20 = sbr.rel (!%p18_p0) target bundleno = 14 (0xe), region = 167 }
 0x188   : > { %s2490_s25 = sld [smem:[#allocation20_spill]] }
 0x18c   :  { %1243 = vsyncpa [#allocation5], 1 }
 0x18d   :  { %1245 = vsyncpa [#allocation5 + $0x1], 1 }
 0x18e   :  { %1246 = vsyncpa [#allocation6], 1 }
 0x18f   :  { %1248 = vsyncpa [#allocation6 + $0x1], 1 }
 0x190   :  { %1249 = vsyncpa [#allocation8], 1 }

</bundles_post_ra>
